<compile_context>
chip_gen: v5e
topology: v5e:2x2
jax: 0.10.0
libtpu: 0.0.40
codegen_flags: <defaults>
</compile_context>

<pallas_src>
import functools

import jax
import jax.numpy as jnp
from jax.experimental import pallas as pl
from jax.experimental.pallas import tpu as pltpu


def _make_divisible(value, divisor, min_value=None, min_ratio=0.9):
    if min_value is None:
        min_value = divisor
    new_value = max(min_value, int(value + divisor / 2) // divisor * divisor)
    if new_value < min_ratio * value:
        new_value += divisor
    return new_value


def _gelu_tanh(x):
    # tanh-approximate GELU (EUP path).  torch.nn.GELU() is the exact erf form; the two
    # differ by <~3e-4 absolute.  The reference below uses this same expression.
    c = 0.7978845608028654  # sqrt(2/pi)
    return 0.5 * x * (1.0 + jnp.tanh(c * (x + 0.044715 * (x * x * x))))


def _repvit_kernel(x_ref, cpk_ref, wpk_ref, out_ref, *, B, H, W, rd, C2):
    C, BHW = out_ref.shape
    HW = H * W
    xf = x_ref[...]                                  # (C, B*HW) f32, channels on sublanes
    cpk = cpk_ref[...]                               # (C, 12 + 3*rd + C2) packed params
    wpk = wpk_ref[...]                               # (C2, C+1) packed channel-mixer fc1

    # --- unpack (static slices, all inside one (8,128) tile -> cheap sub-vreg extracts) ---
    w3 = cpk[:, 0:9]                                 # dw3x3 taps; col 4 = folded centre+dw1x1+id
    bias_tok = cpk[:, 9:10]                          # b3 + b1
    o = 10
    se_w1 = cpk[:, o:o + rd]; o += rd                # (C, rd)
    se_w2 = cpk[:, o:o + rd]; o += rd                # (C, rd)
    se_b2 = cpk[:, o:o + 1]; o += 1                  # (C, 1)
    cm_b2 = cpk[:, o:o + 1]; o += 1                  # (C, 1)
    se_b1 = cpk[0:1, o:o + rd]; o += rd              # (1, rd) (stored row-replicated)
    cm_w2 = cpk[:, o:o + C2]                         # (C, 2C)
    cm_w1 = wpk[:, 0:C]                              # (2C, C)
    cm_b1 = wpk[:, C:C + 1]                          # (2C, 1)

    # --- lane coordinate maps / border masks (built once: single grid step) ---------------
    lane = jax.lax.broadcasted_iota(jnp.int32, (1, BHW), 1)
    if (W & (W - 1)) == 0 and (H & (H - 1)) == 0:    # power-of-two spatial dims -> bit ops
        wcol = jnp.bitwise_and(lane, W - 1)
        hrow = jnp.bitwise_and(jnp.right_shift(lane, (W - 1).bit_length()), H - 1)
    else:
        # TODO(synk): for non power-of-two H/W prefer precomputed masks passed as an input.
        wcol = lane % W
        hrow = (lane // W) % H
    wm = {-1: jnp.where(wcol >= 1, 1.0, 0.0), 1: jnp.where(wcol <= W - 2, 1.0, 0.0)}
    hm = {-1: jnp.where(hrow >= 1, 1.0, 0.0), 1: jnp.where(hrow <= H - 2, 1.0, 0.0)}

    # --- token mixer: RepVGGDW = dw3x3(BN) + dw1x1(BN) + identity --------------------------
    # centre tap + dw1x1 + identity were folded into w3[:, 4] at init -> one FMA.
    acc = xf * w3[:, 4:5] + bias_tok
    for dw in (-1, 0, 1):                            # W-shift hoisted out of the dh loop
        xw = xf if dw == 0 else pltpu.roll(xf, (-dw) % BHW, 1) * wm[dw]
        for dh in (-1, 0, 1):
            if dh == 0 and dw == 0:
                continue                             # centre tap already accumulated
            xs = xw if dh == 0 else pltpu.roll(xw, (-dh * W) % BHW, 1) * hm[dh]
            k = (dh + 1) * 3 + (dw + 1)
            acc = acc + xs * w3[:, k:k + 1]
    t = acc                                          # (C, B*HW)
    # (image boundaries inside the B*HW lane axis are handled by the same masks: a roll that
    #  crosses into the neighbouring image only lands on dest lanes the masks zero out.)

    # --- token mixer: SqueezeExcite, per image (VPU/XLU only; static loop over B) ----------
    gated = []
    for b in range(B):
        tb = t[:, b * HW:(b + 1) * HW]                                           # 128-aligned
        se = jnp.mean(tb, axis=1, keepdims=True)                                 # (C, 1)
        h1 = jnp.maximum(jnp.sum(se * se_w1, axis=0, keepdims=True) + se_b1, 0.0)  # (1, rd)
        g = jnp.sum(h1 * se_w2, axis=1, keepdims=True) + se_b2                   # (C, 1)
        gated.append(tb * (1.0 / (1.0 + jnp.exp(-g))))                           # sigmoid gate
    t = jnp.concatenate(gated, axis=1) if B > 1 else gated[0]

    # --- channel mixer: Residual( 1x1 ConvBN -> GELU(tanh) -> 1x1 ConvBN(bn_w=0) ) --------
    # f32 operands / f32 accumulation, N = B*HW so each weight matrix is pushed once.
    m = jnp.dot(cm_w1, t, preferred_element_type=jnp.float32) + cm_b1
    m = _gelu_tanh(m)
    m = jnp.dot(cm_w2, m, preferred_element_type=jnp.float32) + cm_b2
    out_ref[...] = t + m                             # (C, 512): un-masked, lane-dense store


def repvit_block_forward(x_nchw, packed):
    B, C, H, W = x_nchw.shape
    HW = H * W
    cpk, wpk, rd, C2 = packed['cpack'], packed['wpack'], packed['rd'], packed['c2']
    # wrapper-side layout: fold B into the lane axis -> (C, B*HW).  Tiny XLA transpose of a
    # ~32 KiB array; avoids an in-kernel B<->C sublane shuffle.
    x = jnp.transpose(x_nchw.astype(jnp.float32), (1, 0, 2, 3)).reshape(C, B * HW)
    out = pl.pallas_call(
        functools.partial(_repvit_kernel, B=B, H=H, W=W, rd=rd, C2=C2),
        out_shape=jax.ShapeDtypeStruct((C, B * HW), jnp.float32),
        grid=(1,),                                   # single step: ~100 KiB total, fits VMEM
        in_specs=[
            pl.BlockSpec((C, B * HW), lambda i: (0, 0)),
            pl.BlockSpec(cpk.shape, lambda i: (0, 0)),
            pl.BlockSpec(wpk.shape, lambda i: (0, 0)),
        ],
        out_specs=pl.BlockSpec((C, B * HW), lambda i: (0, 0)),
    )(x, cpk, wpk)
    return jnp.transpose(out.reshape(C, B, H, W), (1, 0, 2, 3))


def init_params(key, inp):
    """Deterministic init matching RepViTBlock(inp, 2*inp, inp, 3, 1, use_se=True, use_hs=True),
    BN folded (eval mode, default running stats).  Returns the 'logical' unpacked params."""
    eps = 1e-5
    C = inp
    hidden = 2 * inp
    rd = _make_divisible(C * 0.25, 8, min_ratio=0.0)
    ks = jax.random.split(key, 8)

    def rnd(k, shape, fan_in):
        bound = (1.0 / fan_in) ** 0.5
        return jax.random.uniform(k, shape, jnp.float32, -bound, bound)

    scale1 = 1.0 / jnp.sqrt(1.0 + eps)   # bn.weight=1, var=1, mean=0, bias=0
    scale0 = 0.0                         # bn.weight=0 (bn_weight_init=0)

    dw3_w = rnd(ks[0], (C, 1, 3, 3), 9)                  # RepVGGDW.conv  (3x3 dw + BN)
    w3 = dw3_w[:, 0].reshape(C, 9) * scale1
    b3 = jnp.zeros((C, 1), jnp.float32)
    dw1_w = rnd(ks[1], (C, 1, 1, 1), 1)                  # RepVGGDW.conv1 (1x1 dw + BN)
    w1 = dw1_w.reshape(C, 1) * scale1
    b1 = jnp.zeros((C, 1), jnp.float32)

    fc1_w = rnd(ks[2], (rd, C, 1, 1), C)                 # SqueezeExcite fc1 / fc2
    fc1_b = rnd(ks[3], (rd,), C)
    fc2_w = rnd(ks[4], (C, rd, 1, 1), rd)
    fc2_b = rnd(ks[5], (C,), rd)
    se_w1 = jnp.transpose(fc1_w[:, :, 0, 0], (1, 0))     # (C, rd)
    se_b1 = fc1_b.reshape(1, rd)
    se_w2 = fc2_w[:, :, 0, 0]                            # (C, rd)
    se_b2 = fc2_b.reshape(C, 1)

    c1_w = rnd(ks[6], (hidden, C, 1, 1), C)              # channel mixer 1x1 convs
    cm_w1 = c1_w[:, :, 0, 0] * scale1                    # (2C, C)
    cm_b1 = jnp.zeros((hidden, 1), jnp.float32)
    c2_w = rnd(ks[7], (C, hidden, 1, 1), hidden)
    cm_w2 = c2_w[:, :, 0, 0] * scale0                    # (C, 2C) — zeros at PyTorch init
    cm_b2 = jnp.zeros((C, 1), jnp.float32)

    return dict(w3=w3, b3=b3, w1=w1, b1=b1, se_w1=se_w1, se_b1=se_b1,
                se_w2=se_w2, se_b2=se_b2, cm_w1=cm_w1, cm_b1=cm_b1,
                cm_w2=cm_w2, cm_b2=cm_b2)


def pack_params(p):
    """One-off packing of the small parameter tensors into two kernel operands."""
    C, rd = p['se_w1'].shape
    C2 = p['cm_w1'].shape[0]
    ctr = p['w3'][:, 4:5] + p['w1'] + 1.0                      # centre + dw1x1 + identity
    w3f = jnp.concatenate([p['w3'][:, :4], ctr, p['w3'][:, 5:]], axis=1)   # (C, 9)
    bias_tok = p['b3'] + p['b1']                               # (C, 1)
    se_b1_rep = jnp.broadcast_to(p['se_b1'], (C, rd))          # kernel reads row 0
    cpack = jnp.concatenate([w3f, bias_tok, p['se_w1'], p['se_w2'],
                             p['se_b2'], p['cm_b2'], se_b1_rep, p['cm_w2']], axis=1)
    wpack = jnp.concatenate([p['cm_w1'], p['cm_b1']], axis=1)  # (2C, C+1)
    return {'cpack': jnp.asarray(cpack, jnp.float32),
            'wpack': jnp.asarray(wpack, jnp.float32),
            'rd': int(rd), 'c2': int(C2)}


def reference_nchw(x_nchw, p):
    """Pure-JAX NCHW reference (same fused params, same tanh GELU) for correctness check."""
    hp = jax.lax.Precision.HIGHEST
    x = x_nchw.astype(jnp.float32)
    B, C, H, W = x.shape
    xp = jnp.pad(x, ((0, 0), (0, 0), (1, 1), (1, 1)))
    w3 = p['w3'].reshape(C, 3, 3)
    acc = jnp.zeros_like(x)
    for kh in range(3):
        for kw in range(3):
            acc = acc + xp[:, :, kh:kh + H, kw:kw + W] * w3[:, kh, kw].reshape(1, C, 1, 1)
    t = (acc + p['b3'].reshape(1, C, 1, 1)) \
        + (x * p['w1'].reshape(1, C, 1, 1) + p['b1'].reshape(1, C, 1, 1)) + x
    se = jnp.mean(t, axis=(2, 3))                                               # (B, C)
    h1 = jnp.maximum(jnp.einsum('bc,cr->br', se, p['se_w1'], precision=hp) + p['se_b1'], 0.0)
    gate = jax.nn.sigmoid(jnp.einsum('br,cr->bc', h1, p['se_w2'], precision=hp)
                          + p['se_b2'].reshape(1, C))
    t = t * gate[:, :, None, None]
    tf = t.reshape(B, C, H * W)
    m = jnp.einsum('nc,bcp->bnp', p['cm_w1'], tf, precision=hp) + p['cm_b1'][None]
    m = _gelu_tanh(m)
    m = jnp.einsum('cn,bnp->bcp', p['cm_w2'], m, precision=hp) + p['cm_b2'][None]
    return (tf + m).reshape(B, C, H, W)


if __name__ == "__main__":
    # RepViTBlock(inp=16, hidden_dim=32, oup=16, kernel_size=3, stride=1, use_se=True, use_hs=True)
    # TODO(synk): only the stride=1 (identity) branch is implemented; the stride=2 downsample
    # branch and the training-time stochastic-depth path of Residual are out of scope here.
    key = jax.random.PRNGKey(0)
    kx, kp, kw2, kb2 = jax.random.split(key, 4)
    B, C, H, W = 2, 16, 16, 16
    x = jax.random.normal(kx, (B, C, H, W), jnp.float32)   # NCHW, like the PyTorch module
    params = init_params(kp, C)
    packed = pack_params(params)

    y = repvit_block_forward(x, packed)
    jax.block_until_ready(y)
    y_ref = reference_nchw(x, params)
    assert y.shape == (B, C, H, W)
    assert jnp.allclose(y, y_ref, atol=1e-4, rtol=1e-4), "mismatch vs reference (default init)"

    # cm_w2 is exactly zero at PyTorch init (bn_weight_init=0), which would hide bugs in the
    # GELU / second 1x1 matmul / cm_b2 path -> re-check with non-zero "trained" weights.
    hidden = params['cm_w1'].shape[0]
    p2 = dict(params)
    p2['cm_w2'] = jax.random.normal(kw2, (C, hidden), jnp.float32) * (1.0 / hidden) ** 0.5
    p2['cm_b2'] = 0.1 * jax.random.normal(kb2, (C, 1), jnp.float32)
    packed2 = pack_params(p2)
    y2 = repvit_block_forward(x, packed2)
    jax.block_until_ready(y2)
    y2_ref = reference_nchw(x, p2)
    assert jnp.allclose(y2, y2_ref, atol=2e-4, rtol=2e-4), "mismatch vs reference (nonzero cm_w2)"
    print("KERNEL_OK")
</pallas_src>

<mosaic_0001>
module attributes {stable_mosaic.version = 11 : i64} {
  func.func @_repvit_kernel(%arg0: i32, %arg1: memref<16x512xf32, #tpu.memory_space<vmem>>, %arg2: memref<16x68xf32, #tpu.memory_space<vmem>>, %arg3: memref<32x17xf32, #tpu.memory_space<vmem>>, %arg4: memref<16x512xf32, #tpu.memory_space<vmem>>) attributes {dimension_semantics = [#tpu.dimension_semantics<arbitrary>], iteration_bounds = array<i64: 1>, scalar_prefetch = 0 : i64, scratch_operands = 0 : i64, tpu.core_type = #tpu.core_type<tc>, window_params = [{pipeline_mode = #tpu.pipeline_mode<synchronous>, transform_indices = @transform_0, window_bounds = array<i64: 16, 512>}, {pipeline_mode = #tpu.pipeline_mode<synchronous>, transform_indices = @transform_1, window_bounds = array<i64: 16, 68>}, {pipeline_mode = #tpu.pipeline_mode<synchronous>, transform_indices = @transform_2, window_bounds = array<i64: 32, 17>}, {pipeline_mode = #tpu.pipeline_mode<synchronous>, transform_indices = @transform_3, window_bounds = array<i64: 16, 512>}]} {
    %c0 = arith.constant 0 : index
    %c0_0 = arith.constant 0 : index
    %0 = vector.load %arg1[%c0, %c0_0] : memref<16x512xf32, #tpu.memory_space<vmem>>, vector<16x512xf32>
    %c0_1 = arith.constant 0 : index
    %c0_2 = arith.constant 0 : index
    %1 = vector.load %arg2[%c0_1, %c0_2] : memref<16x68xf32, #tpu.memory_space<vmem>>, vector<16x68xf32>
    %c0_3 = arith.constant 0 : index
    %c0_4 = arith.constant 0 : index
    %2 = vector.load %arg3[%c0_3, %c0_4] : memref<32x17xf32, #tpu.memory_space<vmem>>, vector<32x17xf32>
    %3 = vector.extract_strided_slice %1 {offsets = [0, 0], sizes = [16, 9], strides = [1, 1]} : vector<16x68xf32> to vector<16x9xf32>
    %4 = vector.extract_strided_slice %1 {offsets = [0, 9], sizes = [16, 1], strides = [1, 1]} : vector<16x68xf32> to vector<16x1xf32>
    %5 = vector.extract_strided_slice %1 {offsets = [0, 10], sizes = [16, 8], strides = [1, 1]} : vector<16x68xf32> to vector<16x8xf32>
    %6 = vector.extract_strided_slice %1 {offsets = [0, 18], sizes = [16, 8], strides = [1, 1]} : vector<16x68xf32> to vector<16x8xf32>
    %7 = vector.extract_strided_slice %1 {offsets = [0, 26], sizes = [16, 1], strides = [1, 1]} : vector<16x68xf32> to vector<16x1xf32>
    %8 = vector.extract_strided_slice %1 {offsets = [0, 27], sizes = [16, 1], strides = [1, 1]} : vector<16x68xf32> to vector<16x1xf32>
    %9 = vector.extract_strided_slice %1 {offsets = [0, 28], sizes = [1, 8], strides = [1, 1]} : vector<16x68xf32> to vector<1x8xf32>
    %10 = vector.extract_strided_slice %1 {offsets = [0, 36], sizes = [16, 32], strides = [1, 1]} : vector<16x68xf32> to vector<16x32xf32>
    %11 = vector.extract_strided_slice %2 {offsets = [0, 0], sizes = [32, 16], strides = [1, 1]} : vector<32x17xf32> to vector<32x16xf32>
    %12 = vector.extract_strided_slice %2 {offsets = [0, 16], sizes = [32, 1], strides = [1, 1]} : vector<32x17xf32> to vector<32x1xf32>
    %13 = tpu.iota {dimensions = array<i32: 1>} : vector<1x512xi32>
    %c15_i32 = arith.constant 15 : i32
    %14 = vector.broadcast %c15_i32 : i32 to vector<1x512xi32>
    %15 = arith.andi %13, %14 : vector<1x512xi32>
    %c4_i32 = arith.constant 4 : i32
    %16 = vector.broadcast %c4_i32 : i32 to vector<1x512xi32>
    %17 = arith.shrsi %13, %16 : vector<1x512xi32>
    %c15_i32_5 = arith.constant 15 : i32
    %18 = vector.broadcast %c15_i32_5 : i32 to vector<1x512xi32>
    %19 = arith.andi %17, %18 : vector<1x512xi32>
    %c1_i32 = arith.constant 1 : i32
    %20 = vector.broadcast %c1_i32 : i32 to vector<1x512xi32>
    %21 = arith.cmpi sge, %15, %20 : vector<1x512xi32>
    %cst = arith.constant 1.000000e+00 : f32
    %cst_6 = arith.constant 0.000000e+00 : f32
    %22 = vector.broadcast %cst : f32 to vector<1x512xf32>
    %23 = vector.broadcast %cst_6 : f32 to vector<1x512xf32>
    %24 = arith.select %21, %22, %23 : vector<1x512xi1>, vector<1x512xf32>
    %c14_i32 = arith.constant 14 : i32
    %25 = vector.broadcast %c14_i32 : i32 to vector<1x512xi32>
    %26 = arith.cmpi sle, %15, %25 : vector<1x512xi32>
    %cst_7 = arith.constant 1.000000e+00 : f32
    %cst_8 = arith.constant 0.000000e+00 : f32
    %27 = vector.broadcast %cst_7 : f32 to vector<1x512xf32>
    %28 = vector.broadcast %cst_8 : f32 to vector<1x512xf32>
    %29 = arith.select %26, %27, %28 : vector<1x512xi1>, vector<1x512xf32>
    %c1_i32_9 = arith.constant 1 : i32
    %30 = vector.broadcast %c1_i32_9 : i32 to vector<1x512xi32>
    %31 = arith.cmpi sge, %19, %30 : vector<1x512xi32>
    %cst_10 = arith.constant 1.000000e+00 : f32
    %cst_11 = arith.constant 0.000000e+00 : f32
    %32 = vector.broadcast %cst_10 : f32 to vector<1x512xf32>
    %33 = vector.broadcast %cst_11 : f32 to vector<1x512xf32>
    %34 = arith.select %31, %32, %33 : vector<1x512xi1>, vector<1x512xf32>
    %c14_i32_12 = arith.constant 14 : i32
    %35 = vector.broadcast %c14_i32_12 : i32 to vector<1x512xi32>
    %36 = arith.cmpi sle, %19, %35 : vector<1x512xi32>
    %cst_13 = arith.constant 1.000000e+00 : f32
    %cst_14 = arith.constant 0.000000e+00 : f32
    %37 = vector.broadcast %cst_13 : f32 to vector<1x512xf32>
    %38 = vector.broadcast %cst_14 : f32 to vector<1x512xf32>
    %39 = arith.select %36, %37, %38 : vector<1x512xi1>, vector<1x512xf32>
    %40 = vector.extract_strided_slice %3 {offsets = [0, 4], sizes = [16, 1], strides = [1, 1]} : vector<16x9xf32> to vector<16x1xf32>
    %41 = vector.broadcast %40 : vector<16x1xf32> to vector<16x512xf32>
    %42 = arith.mulf %0, %41 : vector<16x512xf32>
    %43 = vector.broadcast %4 : vector<16x1xf32> to vector<16x512xf32>
    %44 = arith.addf %42, %43 : vector<16x512xf32>
    %c1_i32_15 = arith.constant 1 : i32
    %45 = tpu.dynamic_rotate %0 by %c1_i32_15 dim 1 : vector<16x512xf32>, i32 -> vector<16x512xf32>
    %46 = vector.broadcast %24 : vector<1x512xf32> to vector<16x512xf32>
    %47 = arith.mulf %45, %46 : vector<16x512xf32>
    %c16_i32 = arith.constant 16 : i32
    %48 = tpu.dynamic_rotate %47 by %c16_i32 dim 1 : vector<16x512xf32>, i32 -> vector<16x512xf32>
    %49 = vector.broadcast %34 : vector<1x512xf32> to vector<16x512xf32>
    %50 = arith.mulf %48, %49 : vector<16x512xf32>
    %51 = vector.extract_strided_slice %3 {offsets = [0, 0], sizes = [16, 1], strides = [1, 1]} : vector<16x9xf32> to vector<16x1xf32>
    %52 = vector.broadcast %51 : vector<16x1xf32> to vector<16x512xf32>
    %53 = arith.mulf %50, %52 : vector<16x512xf32>
    %54 = arith.addf %44, %53 : vector<16x512xf32>
    %55 = vector.extract_strided_slice %3 {offsets = [0, 3], sizes = [16, 1], strides = [1, 1]} : vector<16x9xf32> to vector<16x1xf32>
    %56 = vector.broadcast %55 : vector<16x1xf32> to vector<16x512xf32>
    %57 = arith.mulf %47, %56 : vector<16x512xf32>
    %58 = arith.addf %54, %57 : vector<16x512xf32>
    %c496_i32 = arith.constant 496 : i32
    %59 = tpu.dynamic_rotate %47 by %c496_i32 dim 1 : vector<16x512xf32>, i32 -> vector<16x512xf32>
    %60 = vector.broadcast %39 : vector<1x512xf32> to vector<16x512xf32>
    %61 = arith.mulf %59, %60 : vector<16x512xf32>
    %62 = vector.extract_strided_slice %3 {offsets = [0, 6], sizes = [16, 1], strides = [1, 1]} : vector<16x9xf32> to vector<16x1xf32>
    %63 = vector.broadcast %62 : vector<16x1xf32> to vector<16x512xf32>
    %64 = arith.mulf %61, %63 : vector<16x512xf32>
    %65 = arith.addf %58, %64 : vector<16x512xf32>
    %c16_i32_16 = arith.constant 16 : i32
    %66 = tpu.dynamic_rotate %0 by %c16_i32_16 dim 1 : vector<16x512xf32>, i32 -> vector<16x512xf32>
    %67 = vector.broadcast %34 : vector<1x512xf32> to vector<16x512xf32>
    %68 = arith.mulf %66, %67 : vector<16x512xf32>
    %69 = vector.extract_strided_slice %3 {offsets = [0, 1], sizes = [16, 1], strides = [1, 1]} : vector<16x9xf32> to vector<16x1xf32>
    %70 = vector.broadcast %69 : vector<16x1xf32> to vector<16x512xf32>
    %71 = arith.mulf %68, %70 : vector<16x512xf32>
    %72 = arith.addf %65, %71 : vector<16x512xf32>
    %c496_i32_17 = arith.constant 496 : i32
    %73 = tpu.dynamic_rotate %0 by %c496_i32_17 dim 1 : vector<16x512xf32>, i32 -> vector<16x512xf32>
    %74 = vector.broadcast %39 : vector<1x512xf32> to vector<16x512xf32>
    %75 = arith.mulf %73, %74 : vector<16x512xf32>
    %76 = vector.extract_strided_slice %3 {offsets = [0, 7], sizes = [16, 1], strides = [1, 1]} : vector<16x9xf32> to vector<16x1xf32>
    %77 = vector.broadcast %76 : vector<16x1xf32> to vector<16x512xf32>
    %78 = arith.mulf %75, %77 : vector<16x512xf32>
    %79 = arith.addf %72, %78 : vector<16x512xf32>
    %c511_i32 = arith.constant 511 : i32
    %80 = tpu.dynamic_rotate %0 by %c511_i32 dim 1 : vector<16x512xf32>, i32 -> vector<16x512xf32>
    %81 = vector.broadcast %29 : vector<1x512xf32> to vector<16x512xf32>
    %82 = arith.mulf %80, %81 : vector<16x512xf32>
    %c16_i32_18 = arith.constant 16 : i32
    %83 = tpu.dynamic_rotate %82 by %c16_i32_18 dim 1 : vector<16x512xf32>, i32 -> vector<16x512xf32>
    %84 = vector.broadcast %34 : vector<1x512xf32> to vector<16x512xf32>
    %85 = arith.mulf %83, %84 : vector<16x512xf32>
    %86 = vector.extract_strided_slice %3 {offsets = [0, 2], sizes = [16, 1], strides = [1, 1]} : vector<16x9xf32> to vector<16x1xf32>
    %87 = vector.broadcast %86 : vector<16x1xf32> to vector<16x512xf32>
    %88 = arith.mulf %85, %87 : vector<16x512xf32>
    %89 = arith.addf %79, %88 : vector<16x512xf32>
    %90 = vector.extract_strided_slice %3 {offsets = [0, 5], sizes = [16, 1], strides = [1, 1]} : vector<16x9xf32> to vector<16x1xf32>
    %91 = vector.broadcast %90 : vector<16x1xf32> to vector<16x512xf32>
    %92 = arith.mulf %82, %91 : vector<16x512xf32>
    %93 = arith.addf %89, %92 : vector<16x512xf32>
    %c496_i32_19 = arith.constant 496 : i32
    %94 = tpu.dynamic_rotate %82 by %c496_i32_19 dim 1 : vector<16x512xf32>, i32 -> vector<16x512xf32>
    %95 = vector.broadcast %39 : vector<1x512xf32> to vector<16x512xf32>
    %96 = arith.mulf %94, %95 : vector<16x512xf32>
    %97 = vector.extract_strided_slice %3 {offsets = [0, 8], sizes = [16, 1], strides = [1, 1]} : vector<16x9xf32> to vector<16x1xf32>
    %98 = vector.broadcast %97 : vector<16x1xf32> to vector<16x512xf32>
    %99 = arith.mulf %96, %98 : vector<16x512xf32>
    %100 = arith.addf %93, %99 : vector<16x512xf32>
    %101 = vector.extract_strided_slice %100 {offsets = [0, 0], sizes = [16, 256], strides = [1, 1]} : vector<16x512xf32> to vector<16x256xf32>
    %cst_20 = arith.constant dense<0.000000e+00> : vector<16xf32>
    %102 = vector.multi_reduction <add>, %101, %cst_20 [1] : vector<16x256xf32> to vector<16xf32>
    %103 = vector.shape_cast %102 : vector<16xf32> to vector<16x1xf32>
    %cst_21 = arith.constant 2.560000e+02 : f32
    %104 = vector.broadcast %cst_21 : f32 to vector<16x1xf32>
    %105 = arith.divf %103, %104 : vector<16x1xf32>
    %106 = vector.broadcast %105 : vector<16x1xf32> to vector<16x8xf32>
    %107 = arith.mulf %106, %5 : vector<16x8xf32>
    %cst_22 = arith.constant dense<0.000000e+00> : vector<8xf32>
    %108 = vector.multi_reduction <add>, %107, %cst_22 [0] : vector<16x8xf32> to vector<8xf32>
    %109 = vector.shape_cast %108 : vector<8xf32> to vector<1x8xf32>
    %110 = arith.addf %109, %9 : vector<1x8xf32>
    %cst_23 = arith.constant 0.000000e+00 : f32
    %111 = vector.broadcast %cst_23 : f32 to vector<1x8xf32>
    %112 = arith.maximumf %110, %111 : vector<1x8xf32>
    %113 = vector.broadcast %112 : vector<1x8xf32> to vector<16x8xf32>
    %114 = arith.mulf %113, %6 : vector<16x8xf32>
    %cst_24 = arith.constant dense<0.000000e+00> : vector<16xf32>
    %115 = vector.multi_reduction <add>, %114, %cst_24 [1] : vector<16x8xf32> to vector<16xf32>
    %116 = vector.shape_cast %115 : vector<16xf32> to vector<16x1xf32>
    %117 = arith.addf %116, %7 : vector<16x1xf32>
    %cst_25 = arith.constant 0.000000e+00 : f32
    %118 = vector.broadcast %cst_25 : f32 to vector<16x1xf32>
    %119 = arith.subf %118, %117 : vector<16x1xf32>
    %120 = math.exp %119 : vector<16x1xf32>
    %cst_26 = arith.constant 1.000000e+00 : f32
    %121 = vector.broadcast %cst_26 : f32 to vector<16x1xf32>
    %122 = arith.addf %121, %120 : vector<16x1xf32>
    %cst_27 = arith.constant 1.000000e+00 : f32
    %123 = vector.broadcast %cst_27 : f32 to vector<16x1xf32>
    %124 = arith.divf %123, %122 : vector<16x1xf32>
    %125 = vector.broadcast %124 : vector<16x1xf32> to vector<16x256xf32>
    %126 = arith.mulf %101, %125 : vector<16x256xf32>
    %127 = vector.extract_strided_slice %100 {offsets = [0, 256], sizes = [16, 256], strides = [1, 1]} : vector<16x512xf32> to vector<16x256xf32>
    %cst_28 = arith.constant dense<0.000000e+00> : vector<16xf32>
    %128 = vector.multi_reduction <add>, %127, %cst_28 [1] : vector<16x256xf32> to vector<16xf32>
    %129 = vector.shape_cast %128 : vector<16xf32> to vector<16x1xf32>
    %cst_29 = arith.constant 2.560000e+02 : f32
    %130 = vector.broadcast %cst_29 : f32 to vector<16x1xf32>
    %131 = arith.divf %129, %130 : vector<16x1xf32>
    %132 = vector.broadcast %131 : vector<16x1xf32> to vector<16x8xf32>
    %133 = arith.mulf %132, %5 : vector<16x8xf32>
    %cst_30 = arith.constant dense<0.000000e+00> : vector<8xf32>
    %134 = vector.multi_reduction <add>, %133, %cst_30 [0] : vector<16x8xf32> to vector<8xf32>
    %135 = vector.shape_cast %134 : vector<8xf32> to vector<1x8xf32>
    %136 = arith.addf %135, %9 : vector<1x8xf32>
    %cst_31 = arith.constant 0.000000e+00 : f32
    %137 = vector.broadcast %cst_31 : f32 to vector<1x8xf32>
    %138 = arith.maximumf %136, %137 : vector<1x8xf32>
    %139 = vector.broadcast %138 : vector<1x8xf32> to vector<16x8xf32>
    %140 = arith.mulf %139, %6 : vector<16x8xf32>
    %cst_32 = arith.constant dense<0.000000e+00> : vector<16xf32>
    %141 = vector.multi_reduction <add>, %140, %cst_32 [1] : vector<16x8xf32> to vector<16xf32>
    %142 = vector.shape_cast %141 : vector<16xf32> to vector<16x1xf32>
    %143 = arith.addf %142, %7 : vector<16x1xf32>
    %cst_33 = arith.constant 0.000000e+00 : f32
    %144 = vector.broadcast %cst_33 : f32 to vector<16x1xf32>
    %145 = arith.subf %144, %143 : vector<16x1xf32>
    %146 = math.exp %145 : vector<16x1xf32>
    %cst_34 = arith.constant 1.000000e+00 : f32
    %147 = vector.broadcast %cst_34 : f32 to vector<16x1xf32>
    %148 = arith.addf %147, %146 : vector<16x1xf32>
    %cst_35 = arith.constant 1.000000e+00 : f32
    %149 = vector.broadcast %cst_35 : f32 to vector<16x1xf32>
    %150 = arith.divf %149, %148 : vector<16x1xf32>
    %151 = vector.broadcast %150 : vector<16x1xf32> to vector<16x256xf32>
    %152 = arith.mulf %127, %151 : vector<16x256xf32>
    %153 = tpu.concatenate %126, %152 in 1 : vector<16x256xf32>, vector<16x256xf32> -> vector<16x512xf32>
    %cst_36 = arith.constant dense<0.000000e+00> : vector<32x512xf32>
    %154 = tpu.matmul %11, %153, %cst_36 {dimension_numbers = #tpu.dot_dimension_numbers<[1], [0], [0], [1], [0, 0, 1, 1], [], []>} : vector<32x16xf32>, vector<16x512xf32>, vector<32x512xf32> -> vector<32x512xf32>
    %155 = vector.broadcast %12 : vector<32x1xf32> to vector<32x512xf32>
    %156 = arith.addf %154, %155 : vector<32x512xf32>
    %cst_37 = arith.constant 5.000000e-01 : f32
    %157 = vector.broadcast %cst_37 : f32 to vector<32x512xf32>
    %158 = arith.mulf %157, %156 : vector<32x512xf32>
    %159 = arith.mulf %156, %156 : vector<32x512xf32>
    %160 = arith.mulf %159, %156 : vector<32x512xf32>
    %cst_38 = arith.constant 4.471500e-02 : f32
    %161 = vector.broadcast %cst_38 : f32 to vector<32x512xf32>
    %162 = arith.mulf %161, %160 : vector<32x512xf32>
    %163 = arith.addf %156, %162 : vector<32x512xf32>
    %cst_39 = arith.constant 0.797884583 : f32
    %164 = vector.broadcast %cst_39 : f32 to vector<32x512xf32>
    %165 = arith.mulf %164, %163 : vector<32x512xf32>
    %166 = math.tanh %165 : vector<32x512xf32>
    %cst_40 = arith.constant 1.000000e+00 : f32
    %167 = vector.broadcast %cst_40 : f32 to vector<32x512xf32>
    %168 = arith.addf %167, %166 : vector<32x512xf32>
    %169 = arith.mulf %158, %168 : vector<32x512xf32>
    %cst_41 = arith.constant dense<0.000000e+00> : vector<16x512xf32>
    %170 = tpu.matmul %10, %169, %cst_41 {dimension_numbers = #tpu.dot_dimension_numbers<[1], [0], [0], [1], [0, 0, 1, 1], [], []>} : vector<16x32xf32>, vector<32x512xf32>, vector<16x512xf32> -> vector<16x512xf32>
    %171 = vector.broadcast %8 : vector<16x1xf32> to vector<16x512xf32>
    %172 = arith.addf %170, %171 : vector<16x512xf32>
    %173 = arith.addf %153, %172 : vector<16x512xf32>
    %c0_42 = arith.constant 0 : index
    %c0_43 = arith.constant 0 : index
    %174 = vector.load %arg4[%c0_42, %c0_43] : memref<16x512xf32, #tpu.memory_space<vmem>>, vector<16x512xf32>
    tpu.vector_store %arg4[%c0_42, %c0_43], %173 {strides = array<i32>} : memref<16x512xf32, #tpu.memory_space<vmem>>, vector<16x512xf32>,
    return
  }
  func.func @transform_0(%arg0: i32) -> (i32, i32) {
    %c0_i32 = arith.constant 0 : i32
    %c0_i32_0 = arith.constant 0 : i32
    %c0_i32_1 = arith.constant 0 : i32
    return %c0_i32, %c0_i32_0 : i32, i32
  }
  func.func @transform_1(%arg0: i32) -> (i32, i32) {
    %c0_i32 = arith.constant 0 : i32
    %c0_i32_0 = arith.constant 0 : i32
    %c0_i32_1 = arith.constant 0 : i32
    return %c0_i32, %c0_i32_0 : i32, i32
  }
  func.func @transform_2(%arg0: i32) -> (i32, i32) {
    %c0_i32 = arith.constant 0 : i32
    %c0_i32_0 = arith.constant 0 : i32
    %c0_i32_1 = arith.constant 0 : i32
    return %c0_i32, %c0_i32_0 : i32, i32
  }
  func.func @transform_3(%arg0: i32) -> (i32, i32) {
    %c0_i32 = arith.constant 0 : i32
    %c0_i32_0 = arith.constant 0 : i32
    %c0_i32_1 = arith.constant 0 : i32
    return %c0_i32, %c0_i32_0 : i32, i32
  }
}

</mosaic_0001>

<bundles_post_ra>
// kernel: tpu_custom_call.1
= control target key start
LH: loop header
LB: loop body
LE: loop exit
PB: predicated region body
PF: predicated region fallthrough
CT: control target
= control target key end

     0   :  { %8 = vsyncpa [#allocation3], 0  ;;  %s2490_s0 = inlined_call_operand.hbm [shape: f32[16,512], index: 0, kind: input, shape index: {}]   ;;  %s2491_s1 = inlined_call_operand.vmem [shape: f32[16,68], index: 1, kind: input, shape index: {}]   ;;  %s2492_s2 = inlined_call_operand.vmem [shape: f32[32,17], index: 2, kind: input, shape index: {}]   ;;  %s2493_s3 = inlined_call_operand.hbm [shape: f32[16,512], index: 3, kind: output, shape index: {}]  }
   0x1   :  { %9 = vsyncpa [#allocation4], 0  ;;  %s14_s14 = sshll.u32 %s2490_s0, 4  ;;  %s1398_s15 = smov [#allocation2]   ;;  %s15_s14 = int_to_ptr.hbm [resolvable:$true] %s14_s14 }
   0x2   :  { %s16_s16 = sshll.u32 %s1398_s15, 4  ;;  %s1399_s17 = smov 512   ;;  %s17_s16 = int_to_ptr.vmem [resolvable:$true] %s16_s16 }
   0x3   :  { %s1400_s18 = smov 32  }
   0x4   :  { %22 = dma.hbm_to_vmem [thread:$0]  %s15_s14, 1024, %s17_s16, [#allocation3], %s1399_s17, %s1399_s17, %s1400_s18  }
   0x5   :  { %1394 = dma.done.wait [#allocation3], 1024  }
   0x6   :  { %1395 = vsyncadd [#allocation3], 4294966272  ;;  %v1451_v0 = vld [vmem:[#allocation2 + $0x10] sm:$0xff]  ;;  %v1453_v1 = vld [vmem:[#allocation2 + $0x8] sm:$0xff]  ;;  %s1401_s19 = smov 1   ;;  %v1402_v3 = vmov 4   ;;  %v45_v16 = vlaneseq }
   0x7   :  { %v1455_v2 = vld [vmem:[#allocation2] sm:$0xff]  ;;  %136 = vrot.lane.b32.xlu2 %v1451_v0, %s1401_s19  ;;  %132 = vrot.lane.b32.xlu1 %v1453_v1, %s1401_s19  ;;  %v1460_v4 = vld [vmem:[#allocation2 + $0x30] sm:$0xff]  ;;  %v1462_v5 = vld [vmem:[#allocation2 + $0x28] sm:$0xff]  ;;  %v1403_v7 = vmov 9   ;;  %s1404_s0 = smov 127   ;;  %v1405_v12 = vmov 0  }
   0x8   :  { %128 = vrot.lane.b32.xlu0 %v1455_v2, %s1401_s19  ;;  %1267 = vset.pattern.permute.xlu2 %v1402_v3  ;;  %v1464_v6 = vld [vmem:[#allocation2 + $0x20] sm:$0xff]  ;;  %v1469_v8 = vld [vmem:[#allocation2 + $0x38] sm:$0xff]  ;;  %v1485_v10 = vld [vmem:[%s2491_s1 + $0x8] sm:$0xff]  ;;  %v1406_v13 = vmov 3   ;;  %s1407_s24 = smov 16   ;;  %v1408_v14 = vmov 6  }
   0x9   :  { %1266 = vset.pattern.permute.xlu1 %v1402_v3  ;;  %1268 = vset.pattern.permute.xlu0 %v1403_v7  ;;  %v1471_v9 = vld [vmem:[#allocation2 + $0x18] sm:$0xff]  ;;  %v1490_v11 = vld [vmem:[%s2491_s1] sm:$0xff]  ;;  %v1514_v18 = vand.u32 127, %v45_v16  ;;  %v2494_v24 = vmov 0.0   ;;  %s1410_s25 = smov 112   ;;  %v1411_v60 = vmov 1  }
   0xa   :  { %2508 = vst [vmem:[#allocation8_spill] sm:$0xff] %v1490_v11  ;;  %s1416_s26 = smov 110   ;;  %s1417_s29 = smov 120  }
   0xb   :  { %v1517_v19 = vadd.s32 256, %v1514_v18  ;;  %v1520_v20 = vadd.s32 128, %v1514_v18  ;;  %vm144_vm2 = vcmp.lt.s32.totalorder %v1514_v18, 1  ;;  %v1543_v34 = vadd.s32 384, %v1514_v18  ;;  %s1421_s5 = smov 92  }
   0xc   :  { %v50_v46 = vand.u32 15, %v1514_v18  ;;  %vm177_vm5 = vcmp.lt.s32.totalorder %v1514_v18, 16  ;;  %vm427_vm7 = vcmp.lt.s32.totalorder %v1514_v18, 127  ;;  %vm258_vm15 = vcmp.lt.s32.totalorder %v1514_v18, 112 }
   0xd   :  { %v52_v22 = vand.u32 15, %v1517_v19  ;;  %v51_v23 = vand.u32 15, %v1520_v20  ;;  %v53_v36 = vand.u32 15, %v1543_v34 }
   0xe   :  { %vm62_vm4 = vcmp.ge.s32.totalorder %v50_v46, 1  ;;  %vm70_vm12 = vcmp.le.s32.totalorder %v50_v46, 14 }
   0xf   :  { %138 = vrot.lane.b32.xlu2 %v1460_v4, %s1401_s19  ;;  %134 = vrot.lane.b32.xlu1 %v1462_v5, %s1401_s19  ;;  %vm64_vm0 = vcmp.ge.s32.totalorder %v52_v22, 1  ;;  %vm63_vm1 = vcmp.ge.s32.totalorder %v51_v23, 1  ;;  %vm65_vm3 = vcmp.ge.s32.totalorder %v53_v36, 1  ;;  %v66_v53 = vsel %vm62_vm4, 1.0, %v2494_v24 }
  0x10   :  { %130 = vrot.lane.b32.xlu0 %v1464_v6, %s1401_s19  ;;  %v68_v25 = vsel %vm64_vm0, 1.0, %v2494_v24  ;;  %v67_v27 = vsel %vm63_vm1, 1.0, %v2494_v24  ;;  %v69_v43 = vsel %vm65_vm3, 1.0, %v2494_v24  ;;  %vm71_vm8 = vcmp.le.s32.totalorder %v51_v23, 14 }
  0x11   :  { %vm73_vm9 = vcmp.le.s32.totalorder %v53_v36, 14  ;;  %vm72_vm10 = vcmp.le.s32.totalorder %v52_v22, 14 }
  0x12   :  { %v76_v36 = vsel %vm72_vm10, 1.0, %v2494_v24 }
  0x17   :  { %142 = vrot.lane.b32.xlu1 %v1469_v8, %s1401_s19  ;;  %411 = vrot.lane.b32.xlu2 %v1455_v2, %s1404_s0 }
  0x18   :  { %140 = vrot.lane.b32.xlu0 %v1471_v9, %s1401_s19  ;;  %s1202_s19 = sshll.u32 %s2493_s3, 4  ;;  %s1203_s19 = int_to_ptr.hbm [resolvable:$true] %s1202_s19 }
  0x1f   :  { %417 = vrot.lane.b32.xlu2 %v1462_v5, %s1404_s0  ;;  %415 = vrot.lane.b32.xlu1 %v1453_v1, %s1404_s0 }
  0x20   :  { %413 = vrot.lane.b32.xlu0 %v1464_v6, %s1404_s0 }
  0x27   :  { %423 = vrot.lane.b32.xlu2 %v1471_v9, %s1404_s0  ;;  %421 = vrot.lane.b32.xlu1 %v1460_v4, %s1404_s0 }
  0x28   :  { %419 = vrot.lane.b32.xlu0 %v1451_v0, %s1404_s0 }
  0x2f   :  { %101 = vperm.xlu2 %1267, %v1485_v10   ;;  %96 = vperm.xlu1 %1266, %v1490_v11  }
  0x30   :  { %425 = vrot.lane.b32.xlu0 %v1469_v8, %s1404_s0 }
  0x37   :  { %1270 = vset.pattern.permute.xlu2 %v1405_v12  ;;  %1269 = vset.pattern.permute.xlu1 %v1403_v7 }
  0x38   :  { %113 = vperm.xlu0 %1268, %v1490_v11   ;;  %195 = vperm.xlu2 %1270, %v1490_v11  }
  0x39   :  { %117 = vperm.xlu1 %1269, %v1485_v10  }
  0x40   :  { %1273 = vset.pattern.permute.xlu0 %v1406_v13  ;;  %1272 = vset.pattern.permute.xlu2 %v1406_v13 }
  0x41   :  { %223 = vperm.xlu0 %1273, %v1485_v10   ;;  %219 = vperm.xlu2 %1272, %v1490_v11  }
  0x42   :  { %1271 = vset.pattern.permute.xlu1 %v1405_v12 }
  0x43   :  { %199 = vperm.xlu1 %1271, %v1485_v10  }
  0x49   :  { %305 = vrot.lane.b32.xlu2 %v1462_v5, %s1407_s24  ;;  %311 = vrot.lane.b32.xlu0 %v1471_v9, %s1407_s24 }
  0x4a   :  { %1274 = vset.pattern.permute.xlu2 %v1408_v14  ;;  %1275 = vset.pattern.permute.xlu0 %v1408_v14 }
  0x4b   :  { %303 = vrot.lane.b32.xlu1 %v1453_v1, %s1407_s24 }
  0x51   :  { %309 = vrot.lane.b32.xlu2 %v1460_v4, %s1407_s24 }
  0x53   :  { %307 = vrot.lane.b32.xlu1 %v1451_v0, %s1407_s24 }
  0x59   :  { %276 = vperm.xlu2 %1274, %v1490_v11  }
  0x5b   :  { %313 = vrot.lane.b32.xlu1 %v1469_v8, %s1407_s24 }
  0x61   :  { %v137_v15 = vpop.permute.xlu2 %136  ;;  %1276 = vset.pattern.permute.xlu2 %v1411_v60 }
  0x69   :  { %v139_v17 = vpop.permute.xlu2 %138 }
  0x71   :  { %v1522_v21 = vpop.permute.xlu2 %411 }
  0x79   :  { %v133_v26 = vpop.permute.xlu1 %132  ;;  %v1533_v28 = vpop.permute.xlu2 %417 }
  0x7a   :  { %v147_v29 = vsel %vm144_vm2, %v133_v26, %v137_v15  ;;  %v129_v30 = vpop.permute.xlu0 %128 }
  0x7b   :  { %v155_v31 = vmul.f32 %v147_v29, %v68_v25  ;;  %v149_v32 = vsel %vm144_vm2, %v129_v30, %v133_v26 }
  0x7c   :  { %v1539_v33 = vmul.f32 %v149_v32, %v67_v27 }
  0x7d   :  { %169 = vrot.lane.b32.xlu0 %v155_v31, %s1407_s24 }
  0x7e   :  { %165 = vrot.lane.b32.xlu1 %v1539_v33, %s1407_s24 }
  0x81   :  { %v135_v35 = vpop.permute.xlu1 %134  ;;  %v1548_v37 = vpop.permute.xlu2 %423 }
  0x82   :  { %v148_v38 = vsel %vm144_vm2, %v135_v35, %v139_v17  ;;  %v131_v39 = vpop.permute.xlu0 %130 }
  0x83   :  { %v1552_v40 = vmul.f32 %v148_v38, %v68_v25  ;;  %v150_v41 = vsel %vm144_vm2, %v131_v39, %v135_v35 }
  0x84   :  { %v1556_v42 = vmul.f32 %v150_v41, %v67_v27 }
  0x86   :  { %171 = vrot.lane.b32.xlu1 %v1552_v40, %s1407_s24  ;;  %167 = vrot.lane.b32.xlu2 %v1556_v42, %s1407_s24 }
  0x89   :  { %v143_v44 = vpop.permute.xlu1 %142  ;;  %v102_v45 = vpop.permute.xlu2 %101 }
  0x8a   :  { %v146_v47 = vsel %vm144_vm2, %v139_v17, %v143_v44  ;;  %v141_v48 = vpop.permute.xlu0 %140  ;;  %v152_v52 = vsel %vm144_vm2, %v143_v44, %v131_v39  ;;  %v108_v29 = vmul.f32 %v102_v45, %v1464_v6  ;;  %v111_v32 = vmul.f32 %v102_v45, %v1469_v8 }
  0x8b   :  { %v1568_v49 = vmul.f32 %v146_v47, %v69_v43  ;;  %v145_v50 = vsel %vm144_vm2, %v137_v15, %v141_v48  ;;  %v151_v54 = vsel %vm144_vm2, %v141_v48, %v129_v30  ;;  %v1589_v58 = vmul.f32 %v152_v52, %v66_v53 }
  0x8c   :  { %v156_v51 = vmul.f32 %v145_v50, %v69_v43  ;;  %v1591_v59 = vmul.f32 %v151_v54, %v66_v53  ;;  %v56_v15 = vshra.s32 %v1517_v19, 4  ;;  %v109_v30 = vmul.f32 %v102_v45, %v1462_v5 }
  0x8d   :  { %175 = vrot.lane.b32.xlu0 %v1568_v49, %s1407_s24  ;;  %v1412_v54 = vmov 2  }
  0x8e   :  { %250 = vrot.lane.b32.xlu1 %v155_v31, %s1410_s25  ;;  %173 = vrot.lane.b32.xlu2 %v156_v51, %s1407_s24  ;;  %v1638_v35 = vand.u32 15, %v56_v15 }
  0x8f   :  { %1280 = vset.pattern.permute.xlu1 %v1412_v54 }
  0x90   :  { %vm80_vm6 = vcmp.ge.s32.totalorder %v1638_v35, 1  ;;  %vm88_vm13 = vcmp.le.s32.totalorder %v1638_v35, 14 }
  0x91   :  { %v1583_v55 = vpop.permute.xlu1 %415  ;;  %v1665_v52 = vsel %vm80_vm6, 1.0, %v2494_v24  ;;  %vm629_vm6 = vcmask 64512  }
  0x92   :  { %v1585_v56 = vpop.permute.xlu0 %413  ;;  %v1587_v57 = vpop.permute.xlu2 %195 }
  0x95   :  { %244 = vrot.lane.b32.xlu0 %v1589_v58, %s1410_s25 }
  0x96   :  { %355 = vrot.lane.b32.xlu1 %v1455_v2, %s1410_s25  ;;  %242 = vrot.lane.b32.xlu2 %v1591_v59, %s1410_s25 }
  0x99   :  { %v1599_v61 = vpop.permute.xlu1 %421 }
  0x9a   :  { %v1601_v62 = vpop.permute.xlu0 %419  ;;  %v431_v22 = vsel %vm427_vm7, %v1533_v28, %v1599_v61 }
  0x9b   :  { %v1603_v63 = vpop.permute.xlu2 %219  ;;  %v428_v19 = vsel %vm427_vm7, %v1601_v62, %v1548_v37 }
  0x9c   :  { %v1607_v3 = vmul.f32 %v1603_v63, %v1591_v59  ;;  %v1610_v7 = vmul.f32 %v1603_v63, %v155_v31  ;;  %v1613_v12 = vmul.f32 %v1603_v63, %v156_v51  ;;  %v110_v31 = vmul.f32 %v102_v45, %v1460_v4 }
  0x9d   :  { %254 = vrot.lane.b32.xlu0 %v156_v51, %s1410_s25 }
  0x9e   :  { %256 = vrot.lane.b32.xlu1 %v1568_v49, %s1410_s25  ;;  %252 = vrot.lane.b32.xlu2 %v1552_v40, %s1410_s25 }
  0xa1   :  { %v97_v13 = vpop.permute.xlu1 %96 }
  0xa2   :  { %v1620_v14 = vpop.permute.xlu0 %425  ;;  %v104_v17 = vmul.f32 %v97_v13, %v1455_v2  ;;  %v105_v25 = vmul.f32 %v97_v13, %v1453_v1  ;;  %v106_v26 = vmul.f32 %v97_v13, %v1451_v0  ;;  %v107_v27 = vmul.f32 %v97_v13, %v1471_v9 }
  0xa3   :  { %v1628_v16 = vpop.permute.xlu2 %305 }
  0xa5   :  { %280 = vperm.xlu0 %1275, %v1485_v10  }
  0xa6   :  { %363 = vrot.lane.b32.xlu1 %v1451_v0, %s1410_s25  ;;  %357 = vrot.lane.b32.xlu2 %v1464_v6, %s1410_s25 }
  0xaa   :  { %v114_v38 = vpop.permute.xlu0 %113 }
  0xab   :  { %v1641_v39 = vadd.f32 %v114_v38, %v104_v17  ;;  %v1643_v41 = vadd.f32 %v114_v38, %v105_v25  ;;  %v1645_v0 = vadd.f32 %v114_v38, %v106_v26  ;;  %v1647_v43 = vadd.f32 %v114_v38, %v107_v27  ;;  %v118_v44 = vpop.permute.xlu1 %117  ;;  %v310_v51 = vpop.permute.xlu2 %309 }
  0xac   :  { %v1649_v47 = vadd.f32 %v118_v44, %v108_v29  ;;  %v1651_v48 = vadd.f32 %v118_v44, %v109_v30  ;;  %v1653_v50 = vadd.f32 %v118_v44, %v110_v31  ;;  %v1655_v45 = vadd.f32 %v118_v44, %v111_v32 }
  0xad   :  { %367 = vrot.lane.b32.xlu0 %v1471_v9, %s1410_s25  ;;  %v318_v53 = vsel %vm177_vm5, %v1628_v16, %v310_v51  ;;  %v75_v9 = vsel %vm71_vm8, 1.0, %v2494_v24  ;;  %v57_v25 = vshra.s32 %v1543_v34, 4  ;;  %v1721_v27 = vmul.f32 %v428_v19, %v76_v36 }
  0xae   :  { %369 = vrot.lane.b32.xlu1 %v1469_v8, %s1410_s25  ;;  %365 = vrot.lane.b32.xlu2 %v1460_v4, %s1410_s25  ;;  %v1675_v4 = vmul.f32 %v318_v53, %v1665_v52  ;;  %v430_v8 = vsel %vm427_vm7, %v1583_v55, %v1601_v62  ;;  %v1723_v29 = vmul.f32 %v431_v22, %v75_v9  ;;  %v1413_v34 = vmov 7  }
  0xaf   :  { %1277 = vset.pattern.permute.xlu0 %v1411_v60  ;;  %v1684_v13 = vmul.f32 %v430_v8, %v75_v9  ;;  %v435_v62 = vsel %vm427_vm7, %v1620_v14, %v1585_v56  ;;  %v429_v31 = vsel %vm427_vm7, %v1599_v61, %v1620_v14 }
  0xb0   :  { %2510 = vst [vmem:[#allocation10_spill] sm:$0xff] %v1723_v29  ;;  %v1748_v44 = vmul.f32 %v429_v31, %v76_v36 }
  0xb1   :  { %2509 = vst [vmem:[#allocation9_spill] sm:$0xff] %v1684_v13 }
  0xb3   :  { %v1682_v60 = vpop.permute.xlu0 %223 }
  0xb4   :  { %v1688_v15 = vmul.f32 %v1682_v60, %v1552_v40  ;;  %v1692_v23 = vmul.f32 %v1682_v60, %v1568_v49  ;;  %v77_v40 = vsel %vm73_vm9, 1.0, %v2494_v24  ;;  %v434_v49 = vsel %vm427_vm7, %v1548_v37, %v1522_v21 }
  0xb5   :  { %336 = vperm.xlu0 %1277, %v1485_v10   ;;  %v1697_v17 = vpop.permute.xlu1 %199  ;;  %v1719_v26 = vmul.f32 %v434_v49, %v77_v40  ;;  %v1733_v37 = vand.u32 15, %v57_v25  ;;  %v1746_v38 = vmul.f32 %v435_v62, %v77_v40  ;;  %v74_v40 = vsel %vm70_vm12, 1.0, %v2494_v24 }
  0xb6   :  { %332 = vperm.xlu2 %1276, %v1490_v11   ;;  %448 = vrot.lane.b32.xlu1 %v1684_v13, %s1407_s24  ;;  %v432_v49 = vsel %vm427_vm7, %v1522_v21, %v1583_v55  ;;  %v1414_v25 = vmov 5   ;;  %v1797_v55 = vpop.permute.xlu2 %276  ;;  %v1415_v62 = vmov 8  }
  0xb7   :  { %vm81_vm11 = vcmp.ge.s32.totalorder %v1733_v37, 1  ;;  %v1777_v36 = vmul.f32 %v432_v49, %v74_v40  ;;  %vm89_vm14 = vcmp.le.s32.totalorder %v1733_v37, 14 }
  0xb8   :  { %v1761_v14 = vsel %vm81_vm11, 1.0, %v2494_v24 }
  0xb9   :  { %2511 = vst [vmem:[#allocation11_spill] sm:$0xff] %v1777_v36 }
  0xbb   :  { %v1744_v32 = vpop.permute.xlu0 %311 }
  0xbd   :  { %456 = vrot.lane.b32.xlu0 %v1719_v26, %s1407_s24  ;;  %v1727_v30 = vpop.permute.xlu1 %303 }
  0xbe   :  { %450 = vrot.lane.b32.xlu2 %v1723_v29, %s1407_s24  ;;  %452 = vrot.lane.b32.xlu1 %v1721_v27, %s1407_s24 }
  0xbf   :  { %1279 = vset.pattern.permute.xlu0 %v1413_v34  ;;  %1278 = vset.pattern.permute.xlu2 %v1413_v34 }
  0xc5   :  { %392 = vperm.xlu0 %1279, %v1485_v10   ;;  %v308_v53 = vpop.permute.xlu1 %307 }
  0xc6   :  { %458 = vrot.lane.b32.xlu1 %v1746_v38, %s1407_s24  ;;  %454 = vrot.lane.b32.xlu2 %v1748_v44, %s1407_s24  ;;  %v317_v61 = vsel %vm177_vm5, %v1727_v30, %v308_v53  ;;  %v315_v46 = vsel %vm177_vm5, %v308_v53, %v1744_v32 }
  0xc7   :  { %v1767_v8 = vmul.f32 %v317_v61, %v1665_v52  ;;  %v1770_v9 = vmul.f32 %v315_v46, %v1761_v14 }
  0xcd   :  { %524 = vrot.lane.b32.xlu0 %v1777_v36, %s1410_s25  ;;  %v1781_v19 = vpop.permute.xlu1 %313 }
  0xce   :  { %161 = vrot.lane.b32.xlu1 %v1591_v59, %s1407_s24  ;;  %388 = vperm.xlu2 %1278, %v1490_v11   ;;  %v316_v22 = vsel %vm177_vm5, %v310_v51, %v1781_v19  ;;  %v433_v59 = vsel %vm427_vm7, %v1585_v56, %v1533_v28 }
  0xcf   :  { %1282 = vset.pattern.permute.xlu0 %v1414_v25  ;;  %v1790_v21 = vmul.f32 %v316_v22, %v1761_v14  ;;  %v1804_v51 = vmul.f32 %v433_v59, %v74_v40 }
  0xd1   :  { %2512 = vst [vmem:[#allocation12_spill] sm:$0xff] %v1804_v51 }
  0xd5   :  { %534 = vrot.lane.b32.xlu0 %v1748_v44, %s1410_s25 }
  0xd6   :  { %477 = vperm.xlu1 %1280, %v1490_v11   ;;  %163 = vrot.lane.b32.xlu2 %v1589_v58, %s1407_s24 }
  0xd7   :  { %1281 = vset.pattern.permute.xlu2 %v1412_v54 }
  0xdd   :  { %501 = vperm.xlu0 %1282, %v1490_v11  }
  0xde   :  { %526 = vrot.lane.b32.xlu1 %v1804_v51, %s1410_s25  ;;  %481 = vperm.xlu2 %1281, %v1485_v10  }
  0xdf   :  { %1283 = vset.pattern.permute.xlu1 %v1414_v25 }
  0xe0   :  { %v1810_v34 = vpop.permute.xlu2 %167 }
  0xe5   :  { %1285 = vset.pattern.permute.xlu0 %v1415_v62 }
  0xe6   :  { %536 = vrot.lane.b32.xlu1 %v1719_v26, %s1410_s25  ;;  %532 = vrot.lane.b32.xlu2 %v1721_v27, %s1410_s25 }
  0xe7   :  { %561 = vperm.xlu0 %1285, %v1485_v10   ;;  %1284 = vset.pattern.permute.xlu2 %v1415_v62 }
  0xe8   :  { %v1817_v28 = vpop.permute.xlu2 %173 }
  0xee   :  { %505 = vperm.xlu1 %1283, %v1485_v10   ;;  %538 = vrot.lane.b32.xlu2 %v1746_v38, %s1410_s25 }
  0xef   :  { %444 = vrot.lane.b32.xlu0 %v1777_v36, %s1407_s24  ;;  %v170_v56 = vpop.permute.xlu0 %169 }
  0xf0   :  { %v1824_v54 = vpop.permute.xlu1 %165  ;;  %v1826_v31 = vpop.permute.xlu2 %242  ;;  %v178_v53 = vsel %vm177_vm5, %v170_v56, %v1817_v28 }
  0xf1   :  { %v180_v61 = vsel %vm177_vm5, %v1824_v54, %v170_v56  ;;  %v189_v10 = vmul.f32 %v178_v53, %v1761_v14 }
  0xf2   :  { %v188_v46 = vmul.f32 %v180_v61, %v1665_v52 }
  0xf3   :  { %v205_v40 = vmul.f32 %v1587_v57, %v189_v10 }
  0xf4   :  { %v204_v49 = vmul.f32 %v1587_v57, %v188_v46 }
  0xf5   :  { %v213_v22 = vadd.f32 %v205_v40, %v1647_v43 }
  0xf6   :  { %v212_v25 = vadd.f32 %v204_v49, %v1645_v0  ;;  %248 = vrot.lane.b32.xlu1 %v1556_v42, %s1410_s25  ;;  %246 = vrot.lane.b32.xlu2 %v1539_v33, %s1410_s25 }
  0xf7   :  { %530 = vrot.lane.b32.xlu0 %v1723_v29, %s1410_s25  ;;  %v237_v59 = vadd.f32 %v1613_v12, %v213_v22 }
  0xf8   :  { %v172_v62 = vpop.permute.xlu1 %171  ;;  %v1847_v56 = vpop.permute.xlu2 %252  ;;  %v236_v53 = vadd.f32 %v1610_v7, %v212_v25 }
  0xf9   :  { %v181_v0 = vsel %vm177_vm5, %v1810_v34, %v172_v62 }
  0xfa   :  { %v192_v43 = vmul.f32 %v181_v0, %v1665_v52 }
  0xfc   :  { %v208_v61 = vmul.f32 %v1697_v17, %v192_v43 }
  0xfe   :  { %v216_v10 = vadd.f32 %v208_v61, %v1653_v50  ;;  %299 = vrot.lane.b32.xlu1 %v1455_v2, %s1407_s24  ;;  %557 = vperm.xlu2 %1284, %v1490_v11  }
  0xff   :  { %v1859_v12 = vpop.permute.xlu0 %175 }
 0x100   :  { %v240_v46 = vadd.f32 %v1688_v15, %v216_v10  ;;  %v1862_v7 = vpop.permute.xlu1 %250  ;;  %v1864_v40 = vpop.permute.xlu2 %357  ;;  %v179_v49 = vsel %vm177_vm5, %v172_v62, %v1859_v12 }
 0x101   :  { %v193_v22 = vmul.f32 %v179_v49, %v1761_v14 }
 0x103   :  { %v209_v50 = vmul.f32 %v1697_v17, %v193_v22 }
 0x105   :  { %v217_v2 = vadd.f32 %v209_v50, %v1655_v45 }
 0x106   :  { %359 = vrot.lane.b32.xlu1 %v1453_v1, %s1410_s25  ;;  %301 = vrot.lane.b32.xlu2 %v1464_v6, %s1407_s24  ;;  %v1891_v1 = vsel %vm88_vm13, 1.0, %v2494_v24  ;;  %v1894_v6 = vsel %vm89_vm14, 1.0, %v2494_v24 }
 0x107   :  { %v241_v15 = vadd.f32 %v1692_v23, %v217_v2  ;;  %v1877_v25 = vpop.permute.xlu0 %244 }
 0x108   :  { %v1879_v0 = vpop.permute.xlu1 %355  ;;  %v1881_v43 = vpop.permute.xlu2 %365 }
 0x109   :  { %2513 = vst [vmem:[#allocation13_spill] sm:$0xff] %v1879_v0 }
 0x10e   :  { %446 = vrot.lane.b32.xlu1 %v1804_v51, %s1407_s24  ;;  %361 = vrot.lane.b32.xlu2 %v1462_v5, %s1410_s25 }
 0x10f   :  { %v255_v45 = vpop.permute.xlu0 %254 }
 0x110   :  { %v257_v23 = vpop.permute.xlu1 %256  ;;  %v1896_v62 = vpop.permute.xlu2 %332  ;;  %v259_v35 = vsel %vm258_vm15, %v1862_v7, %v255_v45  ;;  %v265_v37 = vsel %vm258_vm15, %v255_v45, %v1826_v31 }
 0x111   :  { %2514 = vst [vmem:[#allocation14_spill] sm:$0xff] %v1896_v62  ;;  %v260_v5 = vsel %vm258_vm15, %v1847_v56, %v257_v23  ;;  %v266_v61 = vsel %vm258_vm15, %v257_v23, %v1877_v25  ;;  %v269_v22 = vmul.f32 %v259_v35, %v1891_v1  ;;  %v270_v50 = vmul.f32 %v265_v37, %v1894_v6 }
 0x112   :  { %v273_v10 = vmul.f32 %v260_v5, %v1891_v1  ;;  %v274_v49 = vmul.f32 %v266_v61, %v1894_v6  ;;  %v341_v24 = vmul.f32 %v1896_v62, %v1767_v8  ;;  %v342_v29 = vmul.f32 %v1896_v62, %v1770_v9 }
 0x113   :  { %v285_v2 = vmul.f32 %v1797_v55, %v269_v22  ;;  %v286_v45 = vmul.f32 %v1797_v55, %v270_v50 }
 0x115   :  { %v293_v51 = vadd.f32 %v285_v2, %v236_v53  ;;  %v294_v23 = vadd.f32 %v286_v45, %v237_v59  ;;  %v55_v2 = vshra.s32 %v1520_v20, 4 }
 0x116   :  { %528 = vrot.lane.b32.xlu2 %v1684_v13, %s1410_s25 }
 0x117   :  { %v1922_v5 = vpop.permute.xlu0 %280  ;;  %v349_v35 = vadd.f32 %v341_v24, %v293_v51  ;;  %v350_v61 = vadd.f32 %v342_v29, %v294_v23  ;;  %v54_v51 = vshra.s32 %v1514_v18, 4  ;;  %v2527_v18 = vld [vmem:[#allocation12_spill] sm:$0xff] }
 0x118   :  { %v1924_v37 = vpop.permute.xlu1 %363  ;;  %v1926_v22 = vpop.permute.xlu2 %450  ;;  %v289_v50 = vmul.f32 %v1922_v5, %v273_v10  ;;  %v290_v8 = vmul.f32 %v1922_v5, %v274_v49  ;;  %v1942_v49 = vand.u32 15, %v55_v2 }
 0x119   :  { %2515 = vst [vmem:[#allocation15_spill] sm:$0xff] %v1924_v37 }
 0x11a   :  { %2516 = vst [vmem:[#allocation16_spill] sm:$0xff] %v1926_v22  ;;  %v297_v36 = vadd.f32 %v289_v50, %v240_v46  ;;  %v298_v11 = vadd.f32 %v290_v8, %v241_v15  ;;  %v1952_v8 = vand.u32 15, %v54_v51  ;;  %vm79_vm1 = vcmp.ge.s32.totalorder %v1942_v49, 1 }
 0x11b   :  { %vm87_vm2 = vcmp.le.s32.totalorder %v1942_v49, 14 }
 0x11c   :  { %vm78_vm0 = vcmp.ge.s32.totalorder %v1952_v8, 1  ;;  %vm86_vm3 = vcmp.le.s32.totalorder %v1952_v8, 14 }
 0x11f   :  { %v368_v9 = vpop.permute.xlu0 %367 }
 0x120   :  { %v370_v53 = vpop.permute.xlu1 %369  ;;  %v455_v59 = vpop.permute.xlu2 %454  ;;  %v371_v24 = vsel %vm258_vm15, %v1924_v37, %v368_v9  ;;  %v377_v29 = vsel %vm258_vm15, %v368_v9, %v1879_v0 }
 0x121   :  { %v381_v10 = vmul.f32 %v371_v24, %v1891_v1  ;;  %v382_v46 = vmul.f32 %v377_v29, %v1894_v6 }
 0x127   :  { %v1940_v15 = vpop.permute.xlu0 %336 }
 0x128   :  { %v1944_v45 = vpop.permute.xlu1 %448  ;;  %v1946_v20 = vpop.permute.xlu2 %388  ;;  %v345_v23 = vmul.f32 %v1940_v15, %v1675_v4  ;;  %v346_v50 = vmul.f32 %v1940_v15, %v1790_v21  ;;  %v2518_v4 = vmov 0.0  }
 0x129   :  { %2517 = vst [vmem:[#allocation17_spill] sm:$0xff] %v1946_v20  ;;  %v397_v9 = vmul.f32 %v1946_v20, %v381_v10  ;;  %v398_v24 = vmul.f32 %v1946_v20, %v382_v46  ;;  %v1963_v37 = vsel %vm78_vm0, 1.0, %v2518_v4  ;;  %v1966_v21 = vsel %vm79_vm1, 1.0, %v2518_v4 }
 0x12a   :  { %v353_v29 = vadd.f32 %v345_v23, %v297_v36  ;;  %v354_v13 = vadd.f32 %v346_v50, %v298_v11  ;;  %v372_v23 = vsel %vm258_vm15, %v1881_v43, %v370_v53  ;;  %v378_v50 = vsel %vm258_vm15, %v370_v53, %v1864_v40 }
 0x12b   :  { %v1956_v2 = vadd.f32 %v397_v9, %v349_v35  ;;  %v1958_v0 = vadd.f32 %v398_v24, %v350_v61  ;;  %v230_v24 = vmul.f32 %v1682_v60, %v1589_v58 }
 0x12f   :  { %v1968_v51 = vpop.permute.xlu0 %456 }
 0x130   :  { %v453_v10 = vpop.permute.xlu1 %452  ;;  %v164_v46 = vpop.permute.xlu2 %163 }
 0x131   :  { %v183_v11 = vsel %vm177_vm5, %v164_v46, %v1810_v34  ;;  %v185_v36 = vsel %vm177_vm5, %v1859_v12, %v164_v46  ;;  %v463_v34 = vsel %vm177_vm5, %v1926_v22, %v455_v59  ;;  %v231_v46 = vmul.f32 %v1682_v60, %v1556_v42 }
 0x132   :  { %v190_v35 = vmul.f32 %v185_v36, %v1963_v37  ;;  %v191_v61 = vmul.f32 %v183_v11, %v1966_v21  ;;  %v385_v11 = vmul.f32 %v372_v23, %v1891_v1  ;;  %v386_v36 = vmul.f32 %v378_v50, %v1894_v6 }
 0x133   :  { %v474_v22 = vmul.f32 %v463_v34, %v1665_v52 }
 0x134   :  { %v206_v9 = vmul.f32 %v1697_v17, %v190_v35  ;;  %v207_v12 = vmul.f32 %v1697_v17, %v191_v61 }
 0x136   :  { %v214_v53 = vadd.f32 %v206_v9, %v1649_v47  ;;  %v215_v20 = vadd.f32 %v207_v12, %v1651_v48 }
 0x137   :  { %v1998_v62 = vpop.permute.xlu0 %392 }
 0x138   :  { %v2000_v35 = vpop.permute.xlu1 %458  ;;  %v2002_v17 = vpop.permute.xlu2 %481  ;;  %v401_v58 = vmul.f32 %v1998_v62, %v385_v11  ;;  %v402_v42 = vmul.f32 %v1998_v62, %v386_v36  ;;  %v2006_v60 = vadd.f32 %v230_v24, %v214_v53  ;;  %v2008_v61 = vadd.f32 %v231_v46, %v215_v20 }
 0x139   :  { %v461_v47 = vsel %vm177_vm5, %v455_v59, %v2000_v35  ;;  %v490_v23 = vmul.f32 %v2002_v17, %v474_v22  ;;  %v462_v36 = vsel %vm177_vm5, %v1944_v45, %v453_v10  ;;  %v460_v53 = vsel %vm177_vm5, %v453_v10, %v1968_v51 }
 0x13a   :  { %v475_v48 = vmul.f32 %v461_v47, %v1761_v14  ;;  %v409_v50 = vadd.f32 %v401_v58, %v353_v29  ;;  %v410_v34 = vadd.f32 %v402_v42, %v354_v13  ;;  %v227_v42 = vmul.f32 %v1603_v63, %v1539_v33 }
 0x13c   :  { %v491_v9 = vmul.f32 %v2002_v17, %v475_v48  ;;  %v2016_v12 = vadd.f32 %v490_v23, %v409_v50  ;;  %v470_v48 = vmul.f32 %v462_v36, %v1665_v52  ;;  %v471_v23 = vmul.f32 %v460_v53, %v1761_v14 }
 0x13e   :  { %v2018_v11 = vadd.f32 %v491_v9, %v410_v34 }
 0x13f   :  { %v2020_v24 = vpop.permute.xlu0 %524 }
 0x140   :  { %v162_v20 = vpop.permute.xlu1 %161  ;;  %v2022_v46 = vpop.permute.xlu2 %532 }
 0x141   :  { %v182_v59 = vsel %vm177_vm5, %v162_v20, %v1824_v54  ;;  %v184_v22 = vsel %vm177_vm5, %v1817_v28, %v162_v20 }
 0x142   :  { %v186_v13 = vmul.f32 %v184_v22, %v1963_v37  ;;  %v187_v29 = vmul.f32 %v182_v59, %v1966_v21 }
 0x144   :  { %v202_v58 = vmul.f32 %v1587_v57, %v186_v13  ;;  %v203_v54 = vmul.f32 %v1587_v57, %v187_v29 }
 0x146   :  { %v210_v28 = vadd.f32 %v202_v58, %v1641_v39  ;;  %v211_v47 = vadd.f32 %v203_v54, %v1643_v41  ;;  %v2059_v41 = vsel %vm87_vm2, 1.0, %v2518_v4 }
 0x147   :  { %v2046_v50 = vpop.permute.xlu0 %534 }
 0x148   :  { %v2048_v34 = vpop.permute.xlu1 %477  ;;  %v539_v10 = vpop.permute.xlu2 %538  ;;  %v2051_v9 = vadd.f32 %v1607_v3, %v210_v28  ;;  %v235_v57 = vadd.f32 %v227_v42, %v211_v47 }
 0x149   :  { %v486_v20 = vmul.f32 %v2048_v34, %v470_v48  ;;  %v487_v33 = vmul.f32 %v2048_v34, %v471_v23 }
 0x14b   :  { %v494_v63 = vadd.f32 %v486_v20, %v1956_v2  ;;  %v495_v39 = vadd.f32 %v487_v33, %v1958_v0 }
 0x14f   :  { %v2061_v52 = vpop.permute.xlu0 %501 }
 0x150   :  { %v2063_v14 = vpop.permute.xlu1 %526  ;;  %v247_v3 = vpop.permute.xlu2 %246  ;;  %v510_v0 = vmul.f32 %v2061_v52, %v1721_v27  ;;  %v511_v49 = vmul.f32 %v2061_v52, %v1719_v26 }
 0x151   :  { %v261_v59 = vsel %vm258_vm15, %v247_v3, %v1862_v7  ;;  %v547_v20 = vsel %vm258_vm15, %v539_v10, %v2063_v14 }
 0x152   :  { %v268_v22 = vmul.f32 %v261_v59, %v2059_v41  ;;  %v518_v42 = vadd.f32 %v510_v0, %v494_v63  ;;  %v519_v28 = vadd.f32 %v511_v49, %v495_v39  ;;  %v555_v49 = vmul.f32 %v547_v20, %v1894_v6 }
 0x154   :  { %v284_v2 = vmul.f32 %v1797_v55, %v268_v22 }
 0x156   :  { %v2070_v13 = vadd.f32 %v284_v2, %v235_v57  ;;  %v541_v57 = vsel %vm258_vm15, %v2046_v50, %v539_v10 }
 0x157   :  { %v554_v0 = vmul.f32 %v541_v57, %v1891_v1 }
 0x158   :  { %v537_v29 = vpop.permute.xlu1 %536  ;;  %v2076_v36 = vpop.permute.xlu2 %557 }
 0x159   :  { %v540_v53 = vsel %vm258_vm15, %v2022_v46, %v537_v29  ;;  %v546_v7 = vsel %vm258_vm15, %v537_v29, %v2020_v24  ;;  %v2084_v58 = vpop.permute.xlu0 %561 }
 0x15a   :  { %v550_v54 = vmul.f32 %v540_v53, %v1891_v1  ;;  %v551_v27 = vmul.f32 %v546_v7, %v1894_v6  ;;  %v570_v6 = vmul.f32 %v2084_v58, %v554_v0  ;;  %v571_v7 = vmul.f32 %v2084_v58, %v555_v49 }
 0x15c   :  { %v566_v26 = vmul.f32 %v2076_v36, %v550_v54  ;;  %v567_v47 = vmul.f32 %v2076_v36, %v551_v27 }
 0x15e   :  { %v2090_v48 = vadd.f32 %v566_v26, %v518_v42  ;;  %v2092_v23 = vadd.f32 %v567_v47, %v519_v28 }
 0x160   :  { %v2100_v33 = vpop.permute.xlu1 %505  ;;  %v302_v63 = vpop.permute.xlu2 %301  ;;  %v690_v39 = vadd.f32 %v2092_v23, %v2090_v48 }
 0x161   :  { %v514_v59 = vmul.f32 %v2100_v33, %v1748_v44  ;;  %v515_v22 = vmul.f32 %v2100_v33, %v1746_v38  ;;  %v445_v2 = vpop.permute.xlu0 %444  ;;  %v320_v10 = vsel %vm177_vm5, %v302_v63, %v1628_v16  ;;  %v322_v27 = vsel %vm177_vm5, %v1781_v19, %v302_v63 }
 0x162   :  { %v464_v29 = vsel %vm177_vm5, %v445_v2, %v1944_v45  ;;  %691 = vadd.xlane.f32.xlu1 %v690_v39  ;;  %v328_v53 = vmul.f32 %v320_v10, %v1966_v21  ;;  %v327_v47 = vmul.f32 %v322_v27, %v1963_v37 }
 0x163   :  { %v2118_v44 = vmul.f32 %v464_v29, %v1966_v21  ;;  %v522_v38 = vadd.f32 %v514_v59, %v2016_v12  ;;  %v523_v1 = vadd.f32 %v515_v22, %v2018_v11  ;;  %v2134_v12 = vsel %vm86_vm3, 1.0, %v2518_v4 }
 0x164   :  { %v344_v16 = vmul.f32 %v1940_v15, %v328_v53  ;;  %v343_v59 = vmul.f32 %v1940_v15, %v327_v47  ;;  %v2523_v47 = vld [vmem:[#allocation17_spill] sm:$0xff] }
 0x165   :  { %v2126_v54 = vadd.f32 %v570_v6, %v522_v38  ;;  %v2128_v45 = vadd.f32 %v571_v7, %v523_v1  ;;  %v2519_v1 = vld [vmem:[#allocation14_spill] sm:$0xff]  ;;  %v466_v7 = vsel %vm177_vm5, %v1968_v51, %v445_v2 }
 0x167   :  { %v693_v28 = vadd.f32 %v2128_v45, %v2126_v54 }
 0x168   :  { %v249_v11 = vpop.permute.xlu1 %248  ;;  %v362_v42 = vpop.permute.xlu2 %361 }
 0x169   :  { %v262_v8 = vsel %vm258_vm15, %v249_v11, %v1847_v56  ;;  %v264_v26 = vsel %vm258_vm15, %v1877_v25, %v249_v11  ;;  %v374_v19 = vsel %vm258_vm15, %v362_v42, %v1881_v43  ;;  %v376_v4 = vsel %vm258_vm15, %v1864_v40, %v362_v42  ;;  %694 = vadd.xlane.f32.xlu2 %v693_v28  ;;  %v2520_v28 = vld [vmem:[#allocation15_spill] sm:$0xff] }
 0x16a   :  { %v271_v57 = vmul.f32 %v264_v26, %v2134_v12  ;;  %v272_v20 = vmul.f32 %v262_v8, %v2059_v41  ;;  %v384_v56 = vmul.f32 %v374_v19, %v2059_v41  ;;  %v383_v39 = vmul.f32 %v376_v4, %v2134_v12  ;;  %v2521_v26 = vld [vmem:[#allocation13_spill] sm:$0xff]  ;;  %v2522_v19 = vld [vmem:[#allocation8_spill] sm:$0xff] }
 0x16b   :  { %v263_v40 = vsel %vm258_vm15, %v1826_v31, %v247_v3  ;;  %v468_v42 = vmul.f32 %v466_v7, %v1963_v37 }
 0x16c   :  { %v287_v63 = vmul.f32 %v1922_v5, %v271_v57  ;;  %v288_v25 = vmul.f32 %v1922_v5, %v272_v20  ;;  %v400_v43 = vmul.f32 %v1998_v62, %v384_v56  ;;  %v399_v29 = vmul.f32 %v1998_v62, %v383_v39  ;;  %v531_v56 = vpop.permute.xlu0 %530 }
 0x16d   :  { %v267_v5 = vmul.f32 %v263_v40, %v2134_v12  ;;  %v2524_v40 = vld [vmem:[#allocation11_spill] sm:$0xff] }
 0x16e   :  { %v295_v22 = vadd.f32 %v287_v63, %v2006_v60  ;;  %v296_v0 = vadd.f32 %v288_v25, %v2008_v61  ;;  %v484_v25 = vmul.f32 %v2048_v34, %v468_v42 }
 0x16f   :  { %v283_v62 = vmul.f32 %v1797_v55, %v267_v5 }
 0x170   :  { %v351_v49 = vadd.f32 %v343_v59, %v295_v22  ;;  %v352_v10 = vadd.f32 %v344_v16, %v296_v0  ;;  %v300_v53 = vpop.permute.xlu1 %299  ;;  %v529_v16 = vpop.permute.xlu2 %528  ;;  %v508_v59 = vmul.f32 %v2061_v52, %v2524_v40  ;;  %v2525_v22 = vld [vmem:[#allocation9_spill] sm:$0xff] }
 0x171   :  { %v319_v38 = vsel %vm177_vm5, %v300_v53, %v1727_v30  ;;  %v321_v31 = vsel %vm177_vm5, %v1744_v32, %v300_v53  ;;  %v291_v11 = vadd.f32 %v283_v62, %v2051_v9  ;;  %v542_v51 = vsel %vm258_vm15, %v529_v16, %v2022_v46 }
 0x172   :  { %v407_v15 = vadd.f32 %v399_v29, %v351_v49  ;;  %v408_v3 = vadd.f32 %v400_v43, %v352_v10  ;;  %v324_v60 = vmul.f32 %v319_v38, %v1966_v21  ;;  %v323_v61 = vmul.f32 %v321_v31, %v1963_v37  ;;  %v2526_v38 = vld [vmem:[#allocation16_spill] sm:$0xff] }
 0x173   :  { %v549_v46 = vmul.f32 %v542_v51, %v2059_v41  ;;  %v509_v0 = vmul.f32 %v2061_v52, %v2525_v22  ;;  %v543_v49 = vsel %vm258_vm15, %v531_v56, %v2046_v50  ;;  %v545_v10 = vsel %vm258_vm15, %v2063_v14, %v531_v56 }
 0x174   :  { %v340_v6 = vmul.f32 %v2519_v1, %v324_v60  ;;  %v339_v27 = vmul.f32 %v2519_v1, %v323_v61  ;;  %v552_v1 = vmul.f32 %v545_v10, %v2134_v12 }
 0x176   :  { %v348_v30 = vadd.f32 %v340_v6, %v2070_v13  ;;  %v544_v13 = vsel %vm258_vm15, %v2020_v24, %v529_v16  ;;  %v347_v4 = vadd.f32 %v339_v27, %v291_v11  ;;  %v485_v24 = vmul.f32 %v2048_v34, %v2118_v44 }
 0x177   :  { %v548_v63 = vmul.f32 %v544_v13, %v2134_v12  ;;  %v565_v44 = vmul.f32 %v2076_v36, %v549_v46  ;;  %v553_v6 = vmul.f32 %v543_v49, %v2059_v41 }
 0x178   :  { %v360_v32 = vpop.permute.xlu1 %359 }
 0x179   :  { %v373_v8 = vsel %vm258_vm15, %v360_v32, %v2520_v28  ;;  %v375_v55 = vsel %vm258_vm15, %v2521_v26, %v360_v32  ;;  %v564_v34 = vmul.f32 %v2076_v36, %v548_v63  ;;  %v569_v32 = vmul.f32 %v2084_v58, %v553_v6 }
 0x17a   :  { %v379_v9 = vmul.f32 %v375_v55, %v2134_v12  ;;  %v380_v2 = vmul.f32 %v373_v8, %v2059_v41  ;;  %v568_v41 = vmul.f32 %v2084_v58, %v552_v1  ;;  %v2256_v58 = vld [vmem:[%s2491_s1 + $0x8] sm:$0xff] }
 0x17b   :  { %607 = vrot.lane.b32.xlu1 %v2522_v19, %s1416_s26 }
 0x17c   :  { %v395_v57 = vmul.f32 %v2523_v47, %v379_v9  ;;  %v396_v20 = vmul.f32 %v2523_v47, %v380_v2 }
 0x17e   :  { %v403_v39 = vadd.f32 %v395_v57, %v347_v4  ;;  %v404_v43 = vadd.f32 %v396_v20, %v348_v30 }
 0x180   :  { %v447_v29 = vpop.permute.xlu1 %446  ;;  %v492_v53 = vadd.f32 %v484_v25, %v403_v39  ;;  %v493_v5 = vadd.f32 %v485_v24, %v404_v43 }
 0x181   :  { %v465_v31 = vsel %vm177_vm5, %v447_v29, %v2526_v38  ;;  %v467_v52 = vsel %vm177_vm5, %v2000_v35, %v447_v29  ;;  %v512_v35 = vmul.f32 %v2100_v33, %v2527_v18  ;;  %vm597_vm5 = vcmask 146512  }
 0x182   :  { %v472_v50 = vmul.f32 %v467_v52, %v1963_v37  ;;  %v473_v60 = vmul.f32 %v465_v31, %v1966_v21  ;;  %v516_v14 = vadd.f32 %v508_v59, %v492_v53  ;;  %v517_v61 = vadd.f32 %v509_v0, %v493_v5  ;;  %v2528_v37 = vld [vmem:[#allocation10_spill] sm:$0xff] }
 0x183   :  { %v513_v21 = vmul.f32 %v2100_v33, %v2528_v37  ;;  %v2250_v33 = vld [vmem:[%s2491_s1] sm:$0xff]  ;;  %s1419_s1 = smov 118  }
 0x184   :  { %v488_v36 = vmul.f32 %v2002_v17, %v472_v50  ;;  %v489_v62 = vmul.f32 %v2002_v17, %v473_v60  ;;  %v2229_v7 = vadd.f32 %v564_v34, %v516_v14  ;;  %v2231_v30 = vadd.f32 %v565_v44, %v517_v61 }
 0x186   :  { %v496_v16 = vadd.f32 %v488_v36, %v407_v15  ;;  %v497_v27 = vadd.f32 %v489_v62, %v408_v3  ;;  %v580_v12 = vadd.f32 %v2231_v30, %v2229_v7  ;;  %v1418_v15 = vmov 256.0  }
 0x187   :  { %1294 = vrcp.f32 %v1418_v15 }
 0x188   :  { %581 = vadd.xlane.f32.xlu0 %v580_v12  ;;  %v520_v17 = vadd.f32 %v512_v35, %v496_v16  ;;  %v521_v11 = vadd.f32 %v513_v21, %v497_v27 }
 0x18a   :  { %v2241_v42 = vadd.f32 %v568_v41, %v520_v17  ;;  %v2243_v28 = vadd.f32 %v569_v32, %v521_v11 }
 0x18c   :  { %v583_v8 = vadd.f32 %v2243_v28, %v2241_v42 }
 0x18d   :  { %v1295_v3 = vpop.eup %1294 }
 0x18e   :  { %584 = vadd.xlane.f32.xlu2 %v583_v8  ;;  %v587_v26 = vmul.f32 256.0, %v1295_v3  ;;  %vm591_vm4 = vweird.f32 %v1295_v3 }
 0x190   :  { %v588_v55 = vsub.f32 1.0, %v587_v26 }
 0x192   :  { %v589_v51 = vmul.f32 %v1295_v3, %v588_v55 }
 0x194   :  { %v590_v13 = vadd.f32 %v1295_v3, %v589_v51 }
 0x196   :  { %v592_v9 = vsel %vm591_vm4, %v1295_v3, %v590_v13 }
 0x19c   :  { %613 = vrot.lane.b32.xlu0 %v2250_v33, %s1417_s29 }
 0x1a6   :  { %615 = vrot.lane.b32.xlu2 %v2256_v58, %s1417_s29 }
 0x1d5   :  { %v692_v2 = vpop.xlane.xlu1 %691 }
 0x1d6   :  { %v696_v19 = vmul.f32 %v692_v2, %v592_v9 }
 0x1d8   :  { %v698_v57 = vmul.f32 %v2250_v33, %v696_v19 }
 0x1da   :  { %v700_v63 = vsel %vm597_vm5, %v698_v57, 0.0 }
 0x1dc   :  { %v695_v4 = vpop.xlane.xlu2 %694 }
 0x1dd   :  { %v697_v47 = vmul.f32 %v695_v4, %v592_v9 }
 0x1df   :  { %v699_v20 = vmul.f32 %v2256_v58, %v697_v47 }
 0x1e1   :  { %v701_v56 = vsel %vm597_vm5, %v699_v20, 0.0 }
 0x1e2   :  { %v702_v46 = vadd.f32 %v701_v56, %v700_v63 }
 0x1e4   :  { %v703_v25 = vrot.slane %v702_v46, 4 }
 0x1e6   :  { %v704_v24 = vadd.f32 %v703_v25, %v702_v46 }
 0x1e8   :  { %v705_v39 = vrot.slane %v704_v24, 2 }
 0x1ea   :  { %v706_v43 = vadd.f32 %v705_v39, %v704_v24 }
 0x1ec   :  { %v707_v40 = vrot.slane %v706_v43, 1 }
 0x1ed   :  { %v608_v0 = vpop.permute.xlu1 %607 }
 0x1ee   :  { %v708_v22 = vadd.f32 %v707_v40, %v706_v43 }
 0x1f0   :  { %v709_v10 = vadd.f32 %v708_v22, %v608_v0 }
 0x1f2   :  { %v710_v34 = vmax.f32 %v709_v10, 0.0 }
 0x1f4   :  { %v711_v50 = vperm.slane %v710_v34, 0 }
 0x1fb   :  { %v582_v59 = vpop.xlane.xlu0 %581 }
 0x1fc   :  { %v593_v49 = vmul.f32 %v592_v9, %v582_v59 }
 0x1fe   :  { %v595_v53 = vmul.f32 %v2250_v33, %v593_v49 }
 0x200   :  { %v598_v38 = vsel %vm597_vm5, %v595_v53, 0.0 }
 0x201   :  { %v585_v29 = vpop.xlane.xlu2 %584 }
 0x202   :  { %v594_v5 = vmul.f32 %v592_v9, %v585_v29  ;;  %v1420_v9 = vmov 26  }
 0x203   :  { %1288 = vset.pattern.permute.xlu0 %v1420_v9  ;;  %1286 = vset.pattern.permute.xlu2 %v1420_v9 }
 0x204   :  { %v596_v44 = vmul.f32 %v2256_v58, %v594_v5  ;;  %1287 = vset.pattern.permute.xlu1 %v1420_v9 }
 0x206   :  { %v599_v31 = vsel %vm597_vm5, %v596_v44, 0.0 }
 0x207   :  { %v600_v52 = vadd.f32 %v599_v31, %v598_v38 }
 0x209   :  { %v601_v60 = vrot.slane %v600_v52, 4  ;;  %v616_v14 = vpop.permute.xlu2 %615 }
 0x20a   :  { %v713_v61 = vmul.f32 %v711_v50, %v616_v14 }
 0x20b   :  { %v602_v1 = vadd.f32 %v601_v60, %v600_v52 }
 0x20c   :  { %718 = vrot.lane.b32.xlu1 %v713_v61, %s1419_s1 }
 0x20d   :  { %v603_v6 = vrot.slane %v602_v1, 2 }
 0x20e   :  { %v614_v36 = vpop.permute.xlu0 %613 }
 0x20f   :  { %v604_v62 = vadd.f32 %v603_v6, %v602_v1  ;;  %v712_v18 = vmul.f32 %v711_v50, %v614_v36 }
 0x211   :  { %v605_v35 = vrot.slane %v604_v62, 1  ;;  %716 = vrot.lane.b32.xlu0 %v712_v18, %s1419_s1 }
 0x213   :  { %v606_v37 = vadd.f32 %v605_v35, %v604_v62 }
 0x215   :  { %v610_v21 = vadd.f32 %v608_v0, %v606_v37 }
 0x217   :  { %v611_v16 = vmax.f32 %v610_v21, 0.0 }
 0x219   :  { %v612_v27 = vperm.slane %v611_v16, 0 }
 0x21b   :  { %v620_v12 = vmul.f32 %v616_v14, %v612_v27  ;;  %v619_v41 = vmul.f32 %v614_v36, %v612_v27 }
 0x21d   :  { %625 = vrot.lane.b32.xlu2 %v620_v12, %s1419_s1  ;;  %623 = vrot.lane.b32.xlu1 %v619_v41, %s1419_s1 }
 0x277   :  { %v626_v32 = vpop.permute.xlu2 %625 }
 0x278   :  { %v633_v17 = vsel %vm629_vm6, %v626_v32, 0.0 }
 0x279   :  { %634 = vadd.xlane.f32.xlu1 %v633_v17 }
 0x27e   :  { %v719_v11 = vpop.permute.xlu1 %718 }
 0x27f   :  { %v725_v8 = vsel %vm629_vm6, %v719_v11, 0.0 }
 0x280   :  { %726 = vadd.xlane.f32.xlu0 %v725_v8 }
 0x283   :  { %v717_v15 = vpop.permute.xlu0 %716 }
 0x284   :  { %v722_v3 = vsel %vm629_vm6, %v717_v15, 0.0 }
 0x285   :  { %723 = vadd.xlane.f32.xlu2 %v722_v3 }
 0x28f   :  { %v624_v26 = vpop.permute.xlu1 %623 }
 0x290   :  { %v630_v55 = vsel %vm629_vm6, %v624_v26, 0.0 }
 0x291   :  { %631 = vadd.xlane.f32.xlu0 %v630_v55 }
 0x2ec   :  { %v635_v51 = vpop.xlane.xlu1 %634 }
 0x2ed   :  { %v637_v13 = vadd.f32 %v2256_v58, %v635_v51 }
 0x2ef   :  { %v639_v2 = vsub.f32 0.0, %v637_v13 }
 0x2f1   :  { %v642_v19 = vmul.f32 1.442695, %v639_v2 }
 0x2f3   :  { %1296 = vpow2.f32 %v642_v19  ;;  %v727_v4 = vpop.xlane.xlu0 %726 }
 0x2f4   :  { %v729_v47 = vadd.f32 %v2256_v58, %v727_v4 }
 0x2f6   :  { %v731_v57 = vsub.f32 0.0, %v729_v47 }
 0x2f8   :  { %v734_v20 = vmul.f32 1.442695, %v731_v57  ;;  %v724_v56 = vpop.xlane.xlu2 %723 }
 0x2f9   :  { %v1297_v63 = vpop.eup %1296  ;;  %v728_v46 = vadd.f32 %v2250_v33, %v724_v56 }
 0x2fa   :  { %v645_v25 = vadd.f32 1.0, %v1297_v63  ;;  %1298 = vpow2.f32 %v734_v20 }
 0x2fb   :  { %v730_v24 = vsub.f32 0.0, %v728_v46 }
 0x2fc   :  { %1300 = vrcp.f32 %v645_v25  ;;  %v672_v5 = vand.u32 2147483648, %v645_v25  ;;  %v670_v38 = vand.u32 2147483647, %v645_v25  ;;  %vm666_vm8 = vweird.f32 %v645_v25 }
 0x2fd   :  { %v732_v39 = vmul.f32 1.442695, %v730_v24 }
 0x2fe   :  { %v673_v60 = vor.u32 1.1754944e-38, %v672_v5  ;;  %vm671_vm10 = vcmp.eq.f32.partialorder %v670_v38, 8.507059e+37 }
 0x2ff   :  { %1302 = vpow2.f32 %v732_v39  ;;  %v44_v39 = vld [vmem:[%s2492_s2 + $0x18] sm:$0xff] }
 0x300   :  { %v1299_v43 = vpop.eup %1298 }
 0x301   :  { %v737_v40 = vadd.f32 1.0, %v1299_v43  ;;  %v1422_v43 = vmov 16  }
 0x302   :  { %v1301_v59 = vpop.eup %1300 }
 0x303   :  { %1304 = vrcp.f32 %v737_v40  ;;  %v662_v22 = vmul.f32 %v1301_v59, %v645_v25  ;;  %vm667_vm7 = vweird.f32 %v1301_v59  ;;  %v764_v36 = vand.u32 2147483648, %v737_v40 }
 0x304   :  { %v632_v0 = vpop.xlane.xlu0 %631  ;;  %vm668_vm9 = vmor %vm666_vm8, %vm667_vm7  ;;  %v762_v35 = vand.u32 2147483647, %v737_v40  ;;  %vm758_vm12 = vweird.f32 %v737_v40  ;;  %vm802_vm7 = vcmask 130048   ;;  %vm1083_vm8 = vcmask 261120  }
 0x305   :  { %v1303_v49 = vpop.eup %1302  ;;  %v636_v10 = vadd.f32 %v2250_v33, %v632_v0  ;;  %v663_v29 = vsub.f32 1.0, %v662_v22  ;;  %v765_v27 = vor.u32 1.1754944e-38, %v764_v36 }
 0x306   :  { %v736_v53 = vadd.f32 1.0, %v1303_v49  ;;  %vm763_vm14 = vcmp.eq.f32.partialorder %v762_v35, 8.507059e+37 }
 0x307   :  { %v638_v34 = vsub.f32 0.0, %v636_v10  ;;  %v664_v44 = vmul.f32 %v1301_v59, %v663_v29 }
 0x308   :  { %1306 = vrcp.f32 %v736_v53  ;;  %v749_v17 = vand.u32 2147483648, %v736_v53  ;;  %v747_v15 = vand.u32 2147483647, %v736_v53  ;;  %vm743_vm0 = vweird.f32 %v736_v53 }
 0x309   :  { %v1305_v31 = vpop.eup %1304  ;;  %v640_v52 = vmul.f32 1.442695, %v638_v34  ;;  %v665_v50 = vadd.f32 %v1301_v59, %v664_v44 }
 0x30a   :  { %v754_v14 = vmul.f32 %v1305_v31, %v737_v40  ;;  %vm759_vm11 = vweird.f32 %v1305_v31  ;;  %v750_v26 = vor.u32 1.1754944e-38, %v749_v17  ;;  %vm748_vm2 = vcmp.eq.f32.partialorder %v747_v15, 8.507059e+37  ;;  %v43_v40 = vld [vmem:[%s2492_s2 + $0x10] sm:$0xff] }
 0x30b   :  { %1308 = vpow2.f32 %v640_v52  ;;  %v669_v61 = vsel %vm668_vm9, %v1301_v59, %v665_v50  ;;  %vm760_vm13 = vmor %vm758_vm12, %vm759_vm11 }
 0x30c   :  { %v674_v1 = vsel %vm671_vm10, %v673_v60, %v669_v61  ;;  %v755_v6 = vsub.f32 1.0, %v754_v14 }
 0x30d   :  { %683 = vperm.xlu0 %1288, %v674_v1  }
 0x30e   :  { %v1307_v62 = vpop.eup %1306  ;;  %v756_v18 = vmul.f32 %v1305_v31, %v755_v6 }
 0x30f   :  { %v739_v37 = vmul.f32 %v1307_v62, %v736_v53  ;;  %vm744_vm15 = vweird.f32 %v1307_v62 }
 0x310   :  { %v757_v21 = vadd.f32 %v1305_v31, %v756_v18  ;;  %vm745_vm1 = vmor %vm743_vm0, %vm744_vm15 }
 0x311   :  { %v1309_v16 = vpop.eup %1308  ;;  %v740_v12 = vsub.f32 1.0, %v739_v37 }
 0x312   :  { %v644_v41 = vadd.f32 1.0, %v1309_v16  ;;  %v761_v32 = vsel %vm760_vm13, %v1305_v31, %v757_v21 }
 0x313   :  { %v766_v11 = vsel %vm763_vm14, %v765_v27, %v761_v32  ;;  %v741_v8 = vmul.f32 %v1307_v62, %v740_v12 }
 0x314   :  { %1310 = vrcp.f32 %v644_v41  ;;  %775 = vperm.xlu2 %1286, %v766_v11   ;;  %v657_v19 = vand.u32 2147483648, %v644_v41  ;;  %v655_v47 = vand.u32 2147483647, %v644_v41  ;;  %vm651_vm4 = vweird.f32 %v644_v41 }
 0x315   :  { %v742_v3 = vadd.f32 %v1307_v62, %v741_v8  ;;  %1081 = vrot.lane.b32.xlu0 %v2256_v58, %s1421_s5 }
 0x316   :  { %v658_v20 = vor.u32 1.1754944e-38, %v657_v19  ;;  %vm656_vm6 = vcmp.eq.f32.partialorder %v655_v47, 8.507059e+37 }
 0x317   :  { %v746_v55 = vsel %vm745_vm1, %v1307_v62, %v742_v3 }
 0x318   :  { %v751_v51 = vsel %vm748_vm2, %v750_v26, %v746_v55 }
 0x319   :  { %770 = vperm.xlu1 %1287, %v751_v51  }
 0x31a   :  { %v1311_v13 = vpop.eup %1310 }
 0x31b   :  { %v647_v9 = vmul.f32 %v1311_v13, %v644_v41  ;;  %vm652_vm3 = vweird.f32 %v1311_v13 }
 0x31c   :  { %vm653_vm5 = vmor %vm651_vm4, %vm652_vm3 }
 0x31d   :  { %v648_v2 = vsub.f32 1.0, %v647_v9 }
 0x31f   :  { %v649_v4 = vmul.f32 %v1311_v13, %v648_v2 }
 0x321   :  { %v650_v57 = vadd.f32 %v1311_v13, %v649_v4  ;;  %1289 = vset.pattern.permute.xlu1 %v1422_v43 }
 0x322   :  { %799 = vperm.xlu1 %1289, %v44_v39  }
 0x323   :  { %v654_v56 = vsel %vm653_vm5, %v1311_v13, %v650_v57 }
 0x324   :  { %v659_v63 = vsel %vm656_vm6, %v658_v20, %v654_v56 }
 0x325   :  { %678 = vperm.xlu2 %1286, %v659_v63  }
 0x32d   :  { %1290 = vset.pattern.permute.xlu2 %v1422_v43 }
 0x32e   :  { %794 = vperm.xlu2 %1290, %v43_v40  }
 0x36e   :  { %v776_v46 = vpop.permute.xlu2 %775 }
 0x36f   :  { %v2273_v25 = vmul.f32 %v776_v46, %v2126_v54  ;;  %v2276_v24 = vmul.f32 %v776_v46, %v2128_v45  ;;  %v41_v54 = vld [vmem:[%s2492_s2] sm:$0xff]  ;;  %v42_v45 = vld [vmem:[%s2492_s2 + $0x8] sm:$0xff]  ;;  %s1424_s2 = smov [#allocation5]  }
 0x370   :  { %789 = vperm.xlu1 %1289, %v42_v45   ;;  %784 = vperm.xlu2 %1290, %v41_v54   ;;  %s1200_s14 = sshll.u32 %s1424_s2, 4  ;;  %s1201_s14 = int_to_ptr.vmem [resolvable:$true] %s1200_s14 }
 0x371   :  { %883 = vmatpush.msra.mxu2 %v2273_v25  ;;  %912 = vmatpush.msra.mxu3 %v2276_v24 }
 0x378   :  { %1079 = vrot.lane.b32.xlu1 %v2250_v33, %s1421_s5 }
 0x37f   :  { %v679_v59 = vpop.permute.xlu2 %678  ;;  %v684_v22 = vpop.permute.xlu0 %683 }
 0x380   :  { %v2293_v0 = vmul.f32 %v684_v22, %v2241_v42  ;;  %v2296_v49 = vmul.f32 %v684_v22, %v2243_v28  ;;  %v2301_v10 = vmul.f32 %v679_v59, %v2229_v7  ;;  %v2304_v29 = vmul.f32 %v679_v59, %v2231_v30 }
 0x382   :  { %825 = vmatpush.msra.mxu0 %v2293_v0  ;;  %854 = vmatpush.msra.mxu1 %v2296_v49 }
 0x384   :  { %826 = vmatpush.msra.mxu0 %v2301_v10  ;;  %855 = vmatpush.msra.mxu1 %v2304_v29 }
 0x385   :  { %1215 = vmatmul.msk.f32.vlgmr.msra.gmra.mxu0 %vm802_vm7, %v41_v54  ;;  %1219 = vmatmul.msk.f32.vlgmr.msra.gmra.mxu1 %vm802_vm7, %v41_v54 }
 0x38b   :  { %v771_v42 = vpop.permute.xlu1 %770 }
 0x38c   :  { %v2312_v28 = vmul.f32 %v771_v42, %v2090_v48  ;;  %v2315_v7 = vmul.f32 %v771_v42, %v2092_v23  ;;  %v2333_v48 = vpop.permute.xlu2 %794 }
 0x38d   :  { %1216 = vmatmul.msk.f32.gmra.mxu0 %vm802_vm7, %v42_v45  ;;  %1220 = vmatmul.msk.f32.gmra.mxu1 %vm802_vm7, %v42_v45 }
 0x38e   :  { %884 = vmatpush.msra.mxu2 %v2312_v28  ;;  %913 = vmatpush.msra.mxu3 %v2315_v7 }
 0x38f   :  { %1223 = vmatmul.msk.f32.vlgmr.msra.gmra.mxu2 %vm802_vm7, %v41_v54  ;;  %1227 = vmatmul.msk.f32.vlgmr.msra.gmra.mxu3 %vm802_vm7, %v41_v54 }
 0x394   :  { %v2335_v23 = vpop.permute.xlu1 %799 }
 0x395   :  { %1217 = vmatmul.msk.f32.gmra.mxu0 %vm802_vm7, %v43_v40  ;;  %1221 = vmatmul.msk.f32.gmra.mxu1 %vm802_vm7, %v43_v40 }
 0x397   :  { %1224 = vmatmul.msk.f32.gmra.mxu2 %vm802_vm7, %v42_v45  ;;  %1228 = vmatmul.msk.f32.gmra.mxu3 %vm802_vm7, %v42_v45 }
 0x39d   :  { %1218 = vmatmul.msk.f32.gmra.mxu0 %vm802_vm7, %v44_v39  ;;  %1222 = vmatmul.msk.f32.gmra.mxu1 %vm802_vm7, %v44_v39 }
 0x39f   :  { %1225 = vmatmul.msk.f32.gmra.mxu2 %vm802_vm7, %v43_v40  ;;  %1229 = vmatmul.msk.f32.gmra.mxu3 %vm802_vm7, %v43_v40 }
 0x3a7   :  { %1226 = vmatmul.msk.f32.gmra.mxu2 %vm802_vm7, %v44_v39  ;;  %1230 = vmatmul.msk.f32.gmra.mxu3 %vm802_vm7, %v44_v39 }
 0x3ca   :  { %v785_v5 = vpop.permute.xlu2 %784 }
 0x3e2   :  { %v790_v34 = vpop.permute.xlu1 %789 }
 0x402   :  { %v828_v30 = vpop.f32.mrf.mxu0  ;;  %v857_v53 = vpop.f32.mrf.mxu1 }
 0x403   :  { %v2337_v44 = vadd.f32 %v828_v30, %v785_v5  ;;  %v2349_v1 = vadd.f32 %v857_v53, %v785_v5 }
 0x405   :  { %v943_v60 = vmul.f32 %v2337_v44, %v2337_v44  ;;  %v944_v17 = vmul.f32 %v2349_v1, %v2349_v1 }
 0x407   :  { %v959_v62 = vmul.f32 %v943_v60, %v2337_v44  ;;  %v960_v2 = vmul.f32 %v944_v17, %v2349_v1 }
 0x409   :  { %v975_v32 = vmul.f32 0.044715, %v959_v62  ;;  %v976_v22 = vmul.f32 0.044715, %v960_v2 }
 0x40a   :  { %v831_v38 = vpop.f32.mrf.mxu0  ;;  %v860_v31 = vpop.f32.mrf.mxu1 }
 0x40b   :  { %v2339_v52 = vadd.f32 %v831_v38, %v790_v34  ;;  %v2341_v50 = vadd.f32 %v860_v31, %v790_v34  ;;  %v991_v9 = vadd.f32 %v975_v32, %v2337_v44  ;;  %v992_v62 = vadd.f32 %v976_v22, %v2349_v1 }
 0x40d   :  { %v947_v14 = vmul.f32 %v2339_v52, %v2339_v52  ;;  %v948_v61 = vmul.f32 %v2341_v50, %v2341_v50  ;;  %v1007_v59 = vmul.f32 0.7978846, %v991_v9 }
 0x40f   :  { %v963_v16 = vmul.f32 %v947_v14, %v2339_v52  ;;  %v964_v41 = vmul.f32 %v948_v61, %v2341_v50  ;;  %1312 = vtanh.f32 %v1007_v59 }
 0x411   :  { %v979_v15 = vmul.f32 0.044715, %v963_v16  ;;  %v980_v26 = vmul.f32 0.044715, %v964_v41 }
 0x412   :  { %v834_v6 = vpop.f32.mrf.mxu0  ;;  %v863_v36 = vpop.f32.mrf.mxu1 }
 0x413   :  { %v2353_v18 = vadd.f32 %v834_v6, %v2333_v48  ;;  %v2356_v35 = vadd.f32 %v863_v36, %v2333_v48  ;;  %v886_v37 = vpop.f32.mrf.mxu2  ;;  %v915_v21 = vpop.f32.mrf.mxu3  ;;  %v995_v20 = vadd.f32 %v979_v15, %v2339_v52  ;;  %v996_v40 = vadd.f32 %v980_v26, %v2341_v50 }
 0x414   :  { %v2387_v54 = vadd.f32 %v886_v37, %v785_v5  ;;  %v2390_v42 = vadd.f32 %v915_v21, %v785_v5 }
 0x415   :  { %v951_v27 = vmul.f32 %v2353_v18, %v2353_v18  ;;  %v952_v12 = vmul.f32 %v2356_v35, %v2356_v35  ;;  %v1011_v38 = vmul.f32 0.7978846, %v995_v20  ;;  %v1012_v6 = vmul.f32 0.7978846, %v996_v40  ;;  %v1313_v9 = vpop.eup %1312 }
 0x416   :  { %v945_v36 = vmul.f32 %v2387_v54, %v2387_v54  ;;  %v946_v37 = vmul.f32 %v2390_v42, %v2390_v42  ;;  %v936_v59 = vmul.f32 0.5, %v2356_v35 }
 0x417   :  { %v967_v11 = vmul.f32 %v951_v27, %v2353_v18  ;;  %v968_v8 = vmul.f32 %v952_v12, %v2356_v35  ;;  %1314 = vtanh.f32 %v1011_v38 }
 0x419   :  { %v983_v3 = vmul.f32 0.044715, %v967_v11  ;;  %v984_v13 = vmul.f32 0.044715, %v968_v8 }
 0x41a   :  { %v837_v55 = vpop.f32.mrf.mxu0  ;;  %v866_v51 = vpop.f32.mrf.mxu1 }
 0x41b   :  { %v2371_v19 = vadd.f32 %v837_v55, %v2335_v23  ;;  %v2374_v4 = vadd.f32 %v866_v51, %v2335_v23  ;;  %v889_v47 = vpop.f32.mrf.mxu2  ;;  %v918_v57 = vpop.f32.mrf.mxu3  ;;  %v999_v63 = vadd.f32 %v983_v3, %v2353_v18  ;;  %v1000_v45 = vadd.f32 %v984_v13, %v2356_v35 }
 0x41c   :  { %v2377_v56 = vadd.f32 %v889_v47, %v790_v34  ;;  %v2384_v43 = vadd.f32 %v918_v57, %v790_v34  ;;  %v1008_v55 = vmul.f32 0.7978846, %v992_v62  ;;  %v961_v51 = vmul.f32 %v945_v36, %v2387_v54 }
 0x41d   :  { %v955_v46 = vmul.f32 %v2371_v19, %v2371_v19  ;;  %v956_v39 = vmul.f32 %v2374_v4, %v2374_v4  ;;  %v1015_v34 = vmul.f32 0.7978846, %v999_v63  ;;  %v1016_v5 = vmul.f32 0.7978846, %v1000_v45  ;;  %v1315_v20 = vpop.eup %1314 }
 0x41e   :  { %v949_v31 = vmul.f32 %v2377_v56, %v2377_v56  ;;  %v950_v60 = vmul.f32 %v2384_v43, %v2384_v43  ;;  %v962_v13 = vmul.f32 %v946_v37, %v2390_v42  ;;  %v931_v63 = vmul.f32 0.5, %v2339_v52 }
 0x41f   :  { %v971_v30 = vmul.f32 %v955_v46, %v2371_v19  ;;  %v972_v53 = vmul.f32 %v956_v39, %v2374_v4  ;;  %1316 = vtanh.f32 %v1015_v34  ;;  %v2426_v46 = vmul.f32 0.5, %v2341_v50 }
 0x420   :  { %v965_v41 = vmul.f32 %v949_v31, %v2377_v56  ;;  %v966_v11 = vmul.f32 %v950_v60, %v2384_v43  ;;  %1318 = vtanh.f32 %v1012_v6  ;;  %v2429_v39 = vmul.f32 0.5, %v2349_v1 }
 0x421   :  { %v987_v14 = vmul.f32 0.044715, %v971_v30  ;;  %v988_v61 = vmul.f32 0.044715, %v972_v53  ;;  %1320 = vtanh.f32 %v1016_v5  ;;  %v1039_v31 = vadd.f32 1.0, %v1313_v9 }
 0x422   :  { %v981_v57 = vmul.f32 0.044715, %v965_v41  ;;  %v982_v40 = vmul.f32 0.044715, %v966_v11  ;;  %v977_v52 = vmul.f32 0.044715, %v961_v51 }
 0x423   :  { %v892_v21 = vpop.f32.mrf.mxu2  ;;  %v921_v16 = vpop.f32.mrf.mxu3  ;;  %v1003_v27 = vadd.f32 %v987_v14, %v2371_v19  ;;  %v1004_v12 = vadd.f32 %v988_v61, %v2374_v4  ;;  %v1423_v61 = vmov 27   ;;  %v939_v6 = vmul.f32 0.5, %v2371_v19 }
 0x424   :  { %v2407_v32 = vadd.f32 %v892_v21, %v2333_v48  ;;  %v2410_v17 = vadd.f32 %v921_v16, %v2333_v48  ;;  %v2420_v48 = vmul.f32 0.5, %v2337_v44  ;;  %v935_v44 = vmul.f32 0.5, %v2353_v18  ;;  %1292 = vset.pattern.permute.xlu1 %v1423_v61  ;;  %1291 = vset.pattern.permute.xlu2 %v1423_v61 }
 0x425   :  { %v1019_v8 = vmul.f32 0.7978846, %v1003_v27  ;;  %v1020_v15 = vmul.f32 0.7978846, %v1004_v12  ;;  %v1317_v45 = vpop.eup %1316  ;;  %v997_v14 = vadd.f32 %v981_v57, %v2377_v56  ;;  %v978_v18 = vmul.f32 0.044715, %v962_v13  ;;  %1076 = vperm.xlu1 %1292, %v2256_v58   ;;  %1072 = vperm.xlu2 %1291, %v2250_v33  }
 0x426   :  { %v953_v3 = vmul.f32 %v2407_v32, %v2407_v32  ;;  %v954_v26 = vmul.f32 %v2410_v17, %v2410_v17  ;;  %v1319_v30 = vpop.eup %1318  ;;  %v940_v36 = vmul.f32 0.5, %v2374_v4  ;;  %v1047_v5 = vadd.f32 1.0, %v1317_v45  ;;  %1293 = vset.pattern.permute.xlu0 %v1423_v61 }
 0x427   :  { %1322 = vtanh.f32 %v1019_v8  ;;  %v1321_v60 = vpop.eup %1320  ;;  %v998_v62 = vadd.f32 %v982_v40, %v2384_v43  ;;  %v1043_v12 = vadd.f32 1.0, %v1315_v20  ;;  %v993_v13 = vadd.f32 %v977_v52, %v2387_v54 }
 0x428   :  { %v969_v2 = vmul.f32 %v953_v3, %v2407_v32  ;;  %v970_v47 = vmul.f32 %v954_v26, %v2410_v17  ;;  %1324 = vtanh.f32 %v1020_v15  ;;  %v1048_v4 = vadd.f32 1.0, %v1321_v60 }
 0x429   :  { %1326 = vtanh.f32 %v1008_v55  ;;  %v1013_v3 = vmul.f32 0.7978846, %v997_v14  ;;  %v1044_v55 = vadd.f32 1.0, %v1319_v30  ;;  %v1014_v51 = vmul.f32 0.7978846, %v998_v62 }
 0x42a   :  { %v985_v22 = vmul.f32 0.044715, %v969_v2  ;;  %v986_v34 = vmul.f32 0.044715, %v970_v47  ;;  %v1063_v33 = vmul.f32 %v1047_v5, %v935_v44  ;;  %v1064_v57 = vmul.f32 %v1048_v4, %v936_v59  ;;  %v1080_v59 = vpop.permute.xlu1 %1079 }
 0x42b   :  { %v895_v53 = vpop.f32.mrf.mxu2  ;;  %v924_v38 = vpop.f32.mrf.mxu3  ;;  %v994_v45 = vadd.f32 %v978_v18, %v2390_v42  ;;  %1328 = vtanh.f32 %v1013_v3  ;;  %v1055_v44 = vmul.f32 %v1039_v31, %v2420_v48  ;;  %v1009_v60 = vmul.f32 0.7978846, %v993_v13 }
 0x42c   :  { %v2434_v50 = vadd.f32 %v895_v53, %v2335_v23  ;;  %v2437_v1 = vadd.f32 %v924_v38, %v2335_v23  ;;  %v1001_v27 = vadd.f32 %v985_v22, %v2407_v32  ;;  %v1002_v41 = vadd.f32 %v986_v34, %v2410_v17 }
 0x42d   :  { %v1323_v35 = vpop.eup %1322  ;;  %v1059_v22 = vmul.f32 %v1043_v12, %v931_v63  ;;  %v1060_v38 = vmul.f32 %v1044_v55, %v2426_v46  ;;  %1330 = vtanh.f32 %v1014_v51  ;;  %v1010_v14 = vmul.f32 0.7978846, %v994_v45 }
 0x42e   :  { %v1325_v37 = vpop.eup %1324  ;;  %v957_v23 = vmul.f32 %v2434_v50, %v2434_v50  ;;  %v958_v21 = vmul.f32 %v2437_v1, %v2437_v1  ;;  %v1051_v16 = vadd.f32 1.0, %v1323_v35  ;;  %v1017_v47 = vmul.f32 0.7978846, %v1001_v27  ;;  %v1082_v35 = vpop.permute.xlu0 %1081 }
 0x42f   :  { %v1052_v19 = vadd.f32 1.0, %v1325_v37  ;;  %v1327_v58 = vpop.eup %1326  ;;  %v1018_v40 = vmul.f32 0.7978846, %v1002_v41  ;;  %v942_v37 = vmul.f32 0.5, %v2437_v1  ;;  %v938_v41 = vmul.f32 0.5, %v2410_v17 }
 0x430   :  { %v973_v11 = vmul.f32 %v957_v23, %v2434_v50  ;;  %v974_v8 = vmul.f32 %v958_v21, %v2437_v1  ;;  %v1067_v15 = vmul.f32 %v1051_v16, %v939_v6  ;;  %v1040_v20 = vadd.f32 1.0, %v1327_v58 }
 0x431   :  { %v1068_v26 = vmul.f32 %v1052_v19, %v940_v36  ;;  %1332 = vtanh.f32 %v1017_v47  ;;  %v1329_v48 = vpop.eup %1328  ;;  %v937_v19 = vmul.f32 0.5, %v2407_v32  ;;  %v929_v32 = vmul.f32 0.5, %v2387_v54 }
 0x432   :  { %1100 = vmatpush.msrb.mxu0 %v1067_v15  ;;  %v989_v9 = vmul.f32 0.044715, %v973_v11  ;;  %v990_v2 = vmul.f32 0.044715, %v974_v8  ;;  %v1056_v63 = vmul.f32 %v1040_v20, %v2429_v39  ;;  %1334 = vtanh.f32 %v1018_v40 }
 0x433   :  { %1123 = vmatpush.msrb.mxu1 %v1068_v26  ;;  %v1331_v46 = vpop.eup %1330  ;;  %v941_v39 = vmul.f32 0.5, %v2434_v50  ;;  %v1045_v4 = vadd.f32 1.0, %v1329_v48  ;;  %v933_v11 = vmul.f32 0.5, %v2377_v56  ;;  %v934_v15 = vmul.f32 0.5, %v2384_v43 }
 0x434   :  { %1101 = vmatpush.msrb.mxu0 %v1063_v33  ;;  %v1005_v53 = vadd.f32 %v989_v9, %v2434_v50  ;;  %v1006_v30 = vadd.f32 %v990_v2, %v2437_v1  ;;  %v1046_v50 = vadd.f32 1.0, %v1331_v46  ;;  %v930_v51 = vmul.f32 0.5, %v2390_v42 }
 0x435   :  { %1124 = vmatpush.msrb.mxu1 %v1064_v57  ;;  %v1061_v26 = vmul.f32 %v1045_v4, %v933_v11 }
 0x436   :  { %1102 = vmatpush.msrb.mxu0 %v1059_v22  ;;  %v1021_v34 = vmul.f32 0.7978846, %v1005_v53  ;;  %v1022_v52 = vmul.f32 0.7978846, %v1006_v30  ;;  %v1062_v55 = vmul.f32 %v1046_v50, %v934_v15 }
 0x437   :  { %1125 = vmatpush.msrb.mxu1 %v1060_v38  ;;  %v1333_v31 = vpop.eup %1332 }
 0x438   :  { %1103 = vmatpush.msrb.mxu0 %v1055_v44  ;;  %1336 = vtanh.f32 %v1021_v34  ;;  %v1335_v18 = vpop.eup %1334  ;;  %v1049_v5 = vadd.f32 1.0, %v1333_v31 }
 0x439   :  { %1126 = vmatpush.msrb.mxu1 %v1056_v63  ;;  %1231 = vmatmul.msk.f32.vlgmr.msrb.gmra.mxu0 %vm1083_vm8, %v1080_v59  ;;  %1338 = vtanh.f32 %v1022_v52  ;;  %v1050_v21 = vadd.f32 1.0, %v1335_v18 }
 0x43a   :  { %1233 = vmatmul.msk.f32.vlgmr.msrb.gmra.mxu1 %vm1083_vm8, %v1080_v59  ;;  %1340 = vtanh.f32 %v1009_v60  ;;  %v1065_v58 = vmul.f32 %v1049_v5, %v937_v19 }
 0x43b   :  { %1342 = vtanh.f32 %v1010_v14  ;;  %v1066_v8 = vmul.f32 %v1050_v21, %v938_v41 }
 0x43e   :  { %v1337_v61 = vpop.eup %1336 }
 0x43f   :  { %v1339_v6 = vpop.eup %1338  ;;  %v1053_v36 = vadd.f32 1.0, %v1337_v61 }
 0x440   :  { %v1341_v62 = vpop.eup %1340  ;;  %v1054_v23 = vadd.f32 1.0, %v1339_v6 }
 0x441   :  { %v1343_v16 = vpop.eup %1342  ;;  %1232 = vmatmul.msk.f32.gmra.mxu0 %vm1083_vm8, %v1082_v35  ;;  %v1069_v27 = vmul.f32 %v1053_v36, %v941_v39  ;;  %v1041_v1 = vadd.f32 1.0, %v1341_v62 }
 0x442   :  { %1234 = vmatmul.msk.f32.gmra.mxu1 %vm1083_vm8, %v1082_v35  ;;  %v1070_v12 = vmul.f32 %v1054_v23, %v942_v37  ;;  %v1042_v3 = vadd.f32 1.0, %v1343_v16 }
 0x443   :  { %1146 = vmatpush.msrb.mxu2 %v1069_v27  ;;  %v1057_v17 = vmul.f32 %v1041_v1, %v929_v32 }
 0x444   :  { %1169 = vmatpush.msrb.mxu3 %v1070_v12  ;;  %v1058_v13 = vmul.f32 %v1042_v3, %v930_v51 }
 0x445   :  { %1147 = vmatpush.msrb.mxu2 %v1065_v58 }
 0x446   :  { %1170 = vmatpush.msrb.mxu3 %v1066_v8 }
 0x447   :  { %1148 = vmatpush.msrb.mxu2 %v1061_v26 }
 0x448   :  { %1171 = vmatpush.msrb.mxu3 %v1062_v55 }
 0x449   :  { %1149 = vmatpush.msrb.mxu2 %v1057_v17 }
 0x44a   :  { %1172 = vmatpush.msrb.mxu3 %v1058_v13  ;;  %1235 = vmatmul.msk.f32.vlgmr.msrb.gmra.mxu2 %vm1083_vm8, %v1080_v59 }
 0x44b   :  { %1237 = vmatmul.msk.f32.vlgmr.msrb.gmra.mxu3 %vm1083_vm8, %v1080_v59 }
 0x452   :  { %1236 = vmatmul.msk.f32.gmra.mxu2 %vm1083_vm8, %v1082_v35 }
 0x453   :  { %1238 = vmatmul.msk.f32.gmra.mxu3 %vm1083_vm8, %v1082_v35 }
 0x47f   :  { %v1073_v56 = vpop.permute.xlu2 %1072 }
 0x497   :  { %v1077_v47 = vpop.permute.xlu1 %1076 }
 0x4b6   :  { %v1105_v43 = vpop.f32.mrf.mxu0 }
 0x4b7   :  { %v1106_v54 = vadd.f32 %v1105_v43, %v1073_v56  ;;  %v1128_v33 = vpop.f32.mrf.mxu1 }
 0x4b8   :  { %v1129_v9 = vadd.f32 %v1128_v33, %v1073_v56 }
 0x4b9   :  { %v1180_v42 = vadd.f32 %v1106_v54, %v2301_v10 }
 0x4ba   :  { %v1181_v2 = vadd.f32 %v1129_v9, %v2304_v29 }
 0x4bb   :  { %1188 = vst [vmem:[#allocation5] sm:$0xff] %v1180_v42 }
 0x4bc   :  { %1189 = vst [vmem:[#allocation5 + $0x8] sm:$0xff] %v1181_v2 }
 0x4be   :  { %v1108_v57 = vpop.f32.mrf.mxu0 }
 0x4bf   :  { %v1109_v20 = vadd.f32 %v1108_v57, %v1077_v47  ;;  %v1131_v40 = vpop.f32.mrf.mxu1 }
 0x4c0   :  { %v1132_v45 = vadd.f32 %v1131_v40, %v1077_v47 }
 0x4c1   :  { %v1184_v22 = vadd.f32 %v1109_v20, %v2293_v0 }
 0x4c2   :  { %v1185_v53 = vadd.f32 %v1132_v45, %v2296_v49 }
 0x4c3   :  { %1192 = vst [vmem:[#allocation5 + $0x20] sm:$0xff] %v1184_v22 }
 0x4c4   :  { %1193 = vst [vmem:[#allocation5 + $0x28] sm:$0xff] %v1185_v53 }
 0x4cd   :  { %v1151_v30 = vpop.f32.mrf.mxu2 }
 0x4ce   :  { %v1152_v38 = vadd.f32 %v1151_v30, %v1073_v56  ;;  %v1174_v44 = vpop.f32.mrf.mxu3 }
 0x4cf   :  { %v1175_v59 = vadd.f32 %v1174_v44, %v1073_v56 }
 0x4d0   :  { %v1182_v10 = vadd.f32 %v1152_v38, %v2312_v28 }
 0x4d1   :  { %v1183_v29 = vadd.f32 %v1175_v59, %v2315_v7 }
 0x4d2   :  { %1190 = vst [vmem:[#allocation5 + $0x10] sm:$0xff] %v1182_v10 }
 0x4d3   :  { %1191 = vst [vmem:[#allocation5 + $0x18] sm:$0xff] %v1183_v29 }
 0x4d5   :  { %v1154_v34 = vpop.f32.mrf.mxu2 }
 0x4d6   :  { %v1155_v52 = vadd.f32 %v1154_v34, %v1077_v47  ;;  %v1177_v60 = vpop.f32.mrf.mxu3 }
 0x4d7   :  { %v1178_v0 = vadd.f32 %v1177_v60, %v1077_v47 }
 0x4d8   :  { %v1186_v49 = vadd.f32 %v1155_v52, %v2273_v25 }
 0x4d9   :  { %v1187_v63 = vadd.f32 %v1178_v0, %v2276_v24 }
 0x4da   :  { %1194 = vst [vmem:[#allocation5 + $0x30] sm:$0xff] %v1186_v49 }
 0x4db   :  { %1195 = vst [vmem:[#allocation5 + $0x38] sm:$0xff] %v1187_v63 }
 0x4dc   :  { %1208 = dma.vmem_to_hbm [thread:$0]  %s1201_s14, 1024, %s1203_s19, [#allocation4], %s1399_s17, %s1399_s17, %s1400_s18  }
 0x4dd   :  { %1396 = dma.done.wait [#allocation4], 1024  }
 0x4de   :  { %1397 = vsyncadd [#allocation4], 4294966272 }
 0x4df   :  { %1213 = vsyncpa [#allocation3], 1 }
 0x4e0   :  { %1214 = vsyncpa [#allocation4], 1 }

</bundles_post_ra>
